<compile_context>
chip_gen: v5e
topology: v5e:2x2
jax: 0.10.0
libtpu: 0.0.40
codegen_flags: <defaults>
</compile_context>

<pallas_src>
import functools

import jax
import jax.numpy as jnp
from jax.experimental import pallas as pl
from jax.experimental.pallas import tpu as pltpu

EPS = 1e-5
GROWTH = 8        # growth_rate in the PyTorch module
LANE = 128        # TPU lane width


def _round_up(n, m):
    return (n + m - 1) // m * m


def _fma_contract(w, x):
    """(R, K) @ (K, TB) as an explicit VPU broadcast-FMA chain (K is tiny here)."""
    acc = w[:, 0:1] * x[0:1, :]
    for k in range(1, w.shape[1]):
        acc = acc + w[:, k:k + 1] * x[k:k + 1, :]
    return acc


def densenet_kernel(classify, use_cache,
                    nvalid_ref,                 # SMEM (1,) int32: true batch size B
                    x_ref,                      # (F, TB)    input tile (batch on lanes)
                    wx_ref,                     # (2G+1, F)  [w1 | w2a | w3a]^T
                    wh1_ref,                    # (G+1, G)   [w2b | w3b]^T
                    wh2_ref,                    # (1, G)     w3c^T
                    vec_ref,                    # (G, 7)     b1 g1 be1 b2 g2 be2 b3
                    out_ref,                    # (1, TB)
                    s1_ref, q1_ref,             # (G, 1)  z1 sum/sumsq -> BN1 scale/shift
                    s2_ref, q2_ref,             # (G, 1)  z2 sum/sumsq -> BN2 scale/shift
                    *cache):                    # optional: z2 cache, head-partial cache
    G = GROWTH
    cz2_ref, chp_ref = cache if use_cache else (None, None)
    phase = pl.program_id(0)
    tile = pl.program_id(1)
    tb = x_ref.shape[1]

    n_valid = nvalid_ref[0]
    inv_n = 1.0 / n_valid.astype(jnp.float32)

    vec = vec_ref[...]                                  # (G, 7)
    b1, g1, be1 = vec[:, 0:1], vec[:, 1:2], vec[:, 2:3]
    b2, g2, be2 = vec[:, 3:4], vec[:, 4:5], vec[:, 5:6]
    b3 = vec[0:1, 6:7]                                  # (1, 1)

    def masked_stats(z, s_ref, q_ref):
        # Zero out padded batch lanes so BatchNorm statistics stay exact.
        col = jax.lax.broadcasted_iota(jnp.int32, (1, tb), 1) + tile * tb
        zm = jnp.where(col < n_valid, z, 0.0)
        s_ref[...] += jnp.sum(zm, axis=-1, keepdims=True)
        q_ref[...] += jnp.sum(zm * zm, axis=-1, keepdims=True)

    def finalize_bn(s_ref, q_ref, gamma, beta):
        # sums -> (scale, shift) in place.  NOTE: E[z^2]-mu^2 (clamped >= 0) can lose
        # precision vs a centered two-pass variance for huge batches / large means.
        mu = s_ref[...] * inv_n
        var = jnp.maximum(q_ref[...] * inv_n - mu * mu, 0.0)   # biased variance
        scale = gamma * jax.lax.rsqrt(var + EPS)
        s_ref[...] = scale
        q_ref[...] = beta - mu * scale

    # ------------- phase 0: batch statistics of z1 (z1 rows of WX only) -------------
    @pl.when(phase == 0)
    def _():
        @pl.when(tile == 0)
        def _():
            s1_ref[...] = jnp.zeros_like(s1_ref)
            q1_ref[...] = jnp.zeros_like(q1_ref)
            s2_ref[...] = jnp.zeros_like(s2_ref)
            q2_ref[...] = jnp.zeros_like(q2_ref)

        z1 = _fma_contract(wx_ref[...][0:G], x_ref[...]) + b1      # (G, TB)
        masked_stats(z1, s1_ref, q1_ref)
        out_ref[...] = jnp.zeros_like(out_ref)   # keep every block writeback defined

    # ------- phase 1: finalize BN1, layers 1+2, batch statistics of z2 (+cache) -----
    @pl.when(phase == 1)
    def _():
        @pl.when(tile == 0)
        def _():
            finalize_bn(s1_ref, q1_ref, g1, be1)

        x = x_ref[...]
        wx = wx_ref[...]
        wh1 = wh1_ref[...]
        if use_cache:
            zx = _fma_contract(wx, x)                 # (2G+1, TB) incl. head row
        else:
            zx = _fma_contract(wx[0:2 * G], x)        # (2G, TB)   skip head row
        z1 = zx[0:G] + b1
        h1 = jnp.maximum(z1 * s1_ref[...] + q1_ref[...], 0.0)      # BN1 + ReLU
        if use_cache:
            zh1 = _fma_contract(wh1, h1)              # (G+1, TB)  incl. head row
        else:
            zh1 = _fma_contract(wh1[0:G], h1)         # (G, TB)
        z2 = zx[G:2 * G] + zh1[0:G] + b2
        masked_stats(z2, s2_ref, q2_ref)
        if use_cache:
            cz2_ref[tile] = z2
            chp_ref[tile] = zx[2 * G:2 * G + 1] + zh1[G:G + 1]     # head partial
        out_ref[...] = jnp.zeros_like(out_ref)

    # ------------- phase 2: finalize BN2, layer-2 activation + output head ----------
    @pl.when(phase == 2)
    def _():
        @pl.when(tile == 0)
        def _():
            finalize_bn(s2_ref, q2_ref, g2, be2)

        if use_cache:
            z2 = cz2_ref[tile]                        # (G, TB)
            head = chp_ref[tile]                      # (1, TB)
        else:
            # Fallback (very large batches): recompute the phase-1 chain.
            x = x_ref[...]
            zx = _fma_contract(wx_ref[...], x)
            z1 = zx[0:G] + b1
            h1 = jnp.maximum(z1 * s1_ref[...] + q1_ref[...], 0.0)
            zh1 = _fma_contract(wh1_ref[...], h1)
            z2 = zx[G:2 * G] + zh1[0:G] + b2
            head = zx[2 * G:2 * G + 1] + zh1[G:G + 1]
        h2 = jnp.maximum(z2 * s2_ref[...] + q2_ref[...], 0.0)      # BN2 + ReLU
        out = head + _fma_contract(wh2_ref[...], h2) + b3          # (1, TB)
        if classify:
            out = jax.nn.sigmoid(out)
        out_ref[...] = out


def densenet_forward(params, x, t, *, classify=1, batch_tile=4096,
                     cache_vmem_bytes=8 << 20):
    """x: (B, n_features), t: (B, 1).  Returns the predicted outcome, shape (B, 1)."""
    xin = jnp.concatenate([x, t], axis=-1).astype(jnp.float32)        # (B, F)
    B, F = xin.shape
    G = GROWTH

    assert batch_tile % LANE == 0
    tb = min(batch_tile, _round_up(B, LANE))
    b_pad = _round_up(B, tb)
    nt = b_pad // tb

    # Feature-major (lane-dense) layout: (F, B_pad), zero-padded batch columns.
    x_fm = jnp.pad(xin.T, ((0, 0), (0, b_pad - B)))                   # (F, B_pad)

    # Split downstream weights along the concat axis and fuse per-activation blocks.
    w2, w3 = params["w2"], params["w3"]
    wx = jnp.concatenate([params["w1"].T, w2[:F].T, w3[:F].T], axis=0)     # (2G+1, F)
    wh1 = jnp.concatenate([w2[F:].T, w3[F:F + G].T], axis=0)               # (G+1, G)
    wh2 = w3[F + G:].T                                                     # (1, G)

    # Pack all per-feature vectors (biases, gammas, betas) into one small operand.
    b3col = jnp.zeros((G,), jnp.float32).at[0].set(params["b3"][0, 0])
    vec = jnp.stack([params["b1"][0], params["g1"][0], params["be1"][0],
                     params["b2"][0], params["g2"][0], params["be2"][0],
                     b3col], axis=1)                                       # (G, 7)

    n_valid = jnp.array([B], dtype=jnp.int32)

    # z2 + head-partial cache (phase 1 -> phase 2).  (nt, 1, tb) pads to 8 sublanes,
    # so budget with 16 f32 rows per column; fall back to recompute when too big.
    cache_bytes = nt * 16 * tb * 4
    use_cache = cache_bytes <= cache_vmem_bytes

    const = lambda p, i, nv: (0, 0)       # weights: fetched once, VMEM-resident
    batch = lambda p, i, nv: (0, i)       # activations/output: tiled over batch lanes

    scratch = [pltpu.VMEM((G, 1), jnp.float32) for _ in range(4)]
    if use_cache:
        scratch += [pltpu.VMEM((nt, G, tb), jnp.float32),      # z2 cache
                    pltpu.VMEM((nt, 1, tb), jnp.float32)]      # head-partial cache

    out_fm = pl.pallas_call(
        functools.partial(densenet_kernel, bool(classify), use_cache),
        out_shape=jax.ShapeDtypeStruct((1, b_pad), jnp.float32),
        grid_spec=pltpu.PrefetchScalarGridSpec(
            num_scalar_prefetch=1,                        # n_valid -> SMEM
            grid=(3, nt),                                 # (BN phase, batch tile)
            in_specs=[
                pl.BlockSpec((F, tb), batch),             # x (feature-major)
                pl.BlockSpec((2 * G + 1, F), const),      # WX
                pl.BlockSpec((G + 1, G), const),          # WH1
                pl.BlockSpec((1, G), const),              # WH2
                pl.BlockSpec((G, 7), const),              # packed vectors
            ],
            out_specs=pl.BlockSpec((1, tb), batch),
            scratch_shapes=scratch,
        ),
        # Phase axis is sequential; batch axis carries cross-tile BN accumulators
        # and the z2 cache, so neither may be sharded across TensorCores.
        compiler_params=pltpu.CompilerParams(
            dimension_semantics=("arbitrary", "arbitrary")),
    )(n_valid, x_fm, wx, wh1, wh2, vec)

    return out_fm[:, :B].T                                             # (B, 1)


# ----------------------------- reference & params -----------------------------

def _batchnorm_train(z, gamma, beta):
    """BatchNorm1d in training mode: batch mean, biased variance."""
    mu = jnp.mean(z, axis=0, keepdims=True)
    var = jnp.mean((z - mu) * (z - mu), axis=0, keepdims=True)
    return (z - mu) * jax.lax.rsqrt(var + EPS) * gamma + beta


def init_params(key, n_features_plus_1):
    """Deterministic synthetic parameters matching the PyTorch module's shapes."""
    F, G = n_features_plus_1, GROWTH
    keys = jax.random.split(key, 3)

    def lin(k, fan_in, fan_out):
        bound = 1.0 / jnp.sqrt(fan_in)
        kw, kb = jax.random.split(k)
        w = jax.random.uniform(kw, (fan_in, fan_out), jnp.float32, -bound, bound)
        b = jax.random.uniform(kb, (1, fan_out), jnp.float32, -bound, bound)
        return w, b

    w1, b1 = lin(keys[0], F, G)
    w2, b2 = lin(keys[1], F + G, G)
    w3, b3 = lin(keys[2], F + 2 * G, 1)
    return {
        "w1": w1, "b1": b1,
        "g1": jnp.ones((1, G), jnp.float32), "be1": jnp.zeros((1, G), jnp.float32),
        "w2": w2, "b2": b2,
        "g2": jnp.ones((1, G), jnp.float32), "be2": jnp.zeros((1, G), jnp.float32),
        "w3": w3, "b3": b3,
    }


def densenet_ref(params, x, t, *, classify=1):
    """Pure-JAX reference mirroring the PyTorch forward (training-mode BN)."""
    xin = jnp.concatenate([x, t], axis=-1).astype(jnp.float32)
    z1 = xin @ params["w1"] + params["b1"]
    h1 = jnp.maximum(_batchnorm_train(z1, params["g1"], params["be1"]), 0.0)
    d2 = jnp.concatenate([xin, h1], axis=1)
    z2 = d2 @ params["w2"] + params["b2"]
    h2 = jnp.maximum(_batchnorm_train(z2, params["g2"], params["be2"]), 0.0)
    d3 = jnp.concatenate([d2, h2], axis=1)
    out = d3 @ params["w3"] + params["b3"]
    return jax.nn.sigmoid(out) if classify else out


if __name__ == "__main__":
    n_features = 4            # args.n_features; module uses n_features + 1
    classify = 1

    key = jax.random.PRNGKey(0)
    kx, kt, kp, kx2, kt2 = jax.random.split(key, 5)
    params = init_params(kp, n_features + 1)

    # 1) Small single-tile check (batch=8 pads to one 128-lane tile), cached-z2 path.
    batch_size = 8
    x = jax.random.normal(kx, (batch_size, n_features), jnp.float32)
    t = (jax.random.uniform(kt, (batch_size, 1)) > 0.5).astype(jnp.float32)
    out = jax.block_until_ready(densenet_forward(params, x, t, classify=classify))
    ref = densenet_ref(params, x, t, classify=classify)
    assert out.shape == (batch_size, 1)
    assert jnp.allclose(out, ref, atol=1e-5, rtol=1e-4), (out, ref)

    # 2) Multi-tile check (batch=300 -> 3 tiles of 128, 84 padded lanes): exercises
    #    cross-tile BN accumulators, padded-lane masking and the z2/head VMEM cache.
    b2 = 300
    x2 = jax.random.normal(kx2, (b2, n_features), jnp.float32)
    t2 = (jax.random.uniform(kt2, (b2, 1)) > 0.5).astype(jnp.float32)
    ref2 = densenet_ref(params, x2, t2, classify=classify)
    out2 = jax.block_until_ready(
        densenet_forward(params, x2, t2, classify=classify, batch_tile=128))
    assert out2.shape == (b2, 1)
    assert jnp.allclose(out2, ref2, atol=1e-5, rtol=1e-4), (out2, ref2)

    # 3) Same shapes, cache disabled: exercises the recompute fallback path used
    #    when the cache would not fit in VMEM (very large batches).
    out3 = jax.block_until_ready(
        densenet_forward(params, x2, t2, classify=classify, batch_tile=128,
                         cache_vmem_bytes=0))
    assert jnp.allclose(out3, ref2, atol=1e-5, rtol=1e-4), (out3, ref2)

    # 4) Default (large) tile size: single padded tile of 384 lanes.
    out4 = jax.block_until_ready(densenet_forward(params, x2, t2, classify=classify))
    assert jnp.allclose(out4, ref2, atol=1e-5, rtol=1e-4), (out4, ref2)

    print("KERNEL_OK")
</pallas_src>

<mosaic_0001>
module attributes {stable_mosaic.version = 11 : i64} {
  func.func @densenet_kernel(%arg0: i32, %arg1: i32, %arg2: memref<1xi32, #tpu.memory_space<smem>>, %arg3: memref<5x128xf32, #tpu.memory_space<vmem>>, %arg4: memref<17x5xf32, #tpu.memory_space<vmem>>, %arg5: memref<9x8xf32, #tpu.memory_space<vmem>>, %arg6: memref<1x8xf32, #tpu.memory_space<vmem>>, %arg7: memref<8x7xf32, #tpu.memory_space<vmem>>, %arg8: memref<1x128xf32, #tpu.memory_space<vmem>>, %arg9: memref<8x1xf32, #tpu.memory_space<vmem>>, %arg10: memref<8x1xf32, #tpu.memory_space<vmem>>, %arg11: memref<8x1xf32, #tpu.memory_space<vmem>>, %arg12: memref<8x1xf32, #tpu.memory_space<vmem>>, %arg13: memref<1x8x128xf32, #tpu.memory_space<vmem>>, %arg14: memref<1x1x128xf32, #tpu.memory_space<vmem>>) attributes {dimension_semantics = [#tpu.dimension_semantics<arbitrary>, #tpu.dimension_semantics<arbitrary>], iteration_bounds = array<i64: 3, 1>, scalar_prefetch = 1 : i64, scratch_operands = 6 : i64, tpu.core_type = #tpu.core_type<tc>, window_params = [{transform_indices = @transform_0, window_bounds = array<i64: 5, 128>}, {pipeline_mode = #tpu.pipeline_mode<synchronous>, transform_indices = @transform_1, window_bounds = array<i64: 17, 5>}, {pipeline_mode = #tpu.pipeline_mode<synchronous>, transform_indices = @transform_2, window_bounds = array<i64: 9, 8>}, {pipeline_mode = #tpu.pipeline_mode<synchronous>, transform_indices = @transform_3, window_bounds = array<i64: 1, 8>}, {pipeline_mode = #tpu.pipeline_mode<synchronous>, transform_indices = @transform_4, window_bounds = array<i64: 8, 7>}, {transform_indices = @transform_5, window_bounds = array<i64: 1, 128>}]} {
    %c0 = arith.constant 0 : index
    %0 = memref.load %arg2[%c0] : memref<1xi32, #tpu.memory_space<smem>>
    %1 = arith.sitofp %0 : i32 to f32
    %cst = arith.constant 1.000000e+00 : f32
    %2 = arith.divf %cst, %1 : f32
    %c0_0 = arith.constant 0 : index
    %c0_1 = arith.constant 0 : index
    %3 = vector.load %arg7[%c0_0, %c0_1] : memref<8x7xf32, #tpu.memory_space<vmem>>, vector<8x7xf32>
    %4 = vector.extract_strided_slice %3 {offsets = [0, 0], sizes = [8, 1], strides = [1, 1]} : vector<8x7xf32> to vector<8x1xf32>
    %5 = vector.extract_strided_slice %3 {offsets = [0, 1], sizes = [8, 1], strides = [1, 1]} : vector<8x7xf32> to vector<8x1xf32>
    %6 = vector.extract_strided_slice %3 {offsets = [0, 2], sizes = [8, 1], strides = [1, 1]} : vector<8x7xf32> to vector<8x1xf32>
    %7 = vector.extract_strided_slice %3 {offsets = [0, 3], sizes = [8, 1], strides = [1, 1]} : vector<8x7xf32> to vector<8x1xf32>
    %8 = vector.extract_strided_slice %3 {offsets = [0, 4], sizes = [8, 1], strides = [1, 1]} : vector<8x7xf32> to vector<8x1xf32>
    %9 = vector.extract_strided_slice %3 {offsets = [0, 5], sizes = [8, 1], strides = [1, 1]} : vector<8x7xf32> to vector<8x1xf32>
    %10 = vector.extract_strided_slice %3 {offsets = [0, 6], sizes = [1, 1], strides = [1, 1]} : vector<8x7xf32> to vector<1x1xf32>
    %c0_i32 = arith.constant 0 : i32
    %11 = arith.cmpi eq, %arg0, %c0_i32 : i32
    %12 = arith.extui %11 : i1 to i32
    %c0_i32_2 = arith.constant 0 : i32
    %13 = arith.cmpi ne, %12, %c0_i32_2 : i32
    scf.if %13 {
      %c0_i32_5 = arith.constant 0 : i32
      %20 = arith.cmpi eq, %arg1, %c0_i32_5 : i32
      %21 = arith.extui %20 : i1 to i32
      %c0_i32_6 = arith.constant 0 : i32
      %22 = arith.cmpi ne, %21, %c0_i32_6 : i32
      scf.if %22 {
        %cst_25 = arith.constant 0.000000e+00 : f32
        %80 = vector.broadcast %cst_25 : f32 to vector<8x1xf32>
        %c0_26 = arith.constant 0 : index
        %c0_27 = arith.constant 0 : index
        %81 = vector.load %arg9[%c0_26, %c0_27] : memref<8x1xf32, #tpu.memory_space<vmem>>, vector<8x1xf32>
        tpu.vector_store %arg9[%c0_26, %c0_27], %80 {strides = array<i32>} : memref<8x1xf32, #tpu.memory_space<vmem>>, vector<8x1xf32>,
        %cst_28 = arith.constant 0.000000e+00 : f32
        %82 = vector.broadcast %cst_28 : f32 to vector<8x1xf32>
        %c0_29 = arith.constant 0 : index
        %c0_30 = arith.constant 0 : index
        %83 = vector.load %arg10[%c0_29, %c0_30] : memref<8x1xf32, #tpu.memory_space<vmem>>, vector<8x1xf32>
        tpu.vector_store %arg10[%c0_29, %c0_30], %82 {strides = array<i32>} : memref<8x1xf32, #tpu.memory_space<vmem>>, vector<8x1xf32>,
        %cst_31 = arith.constant 0.000000e+00 : f32
        %84 = vector.broadcast %cst_31 : f32 to vector<8x1xf32>
        %c0_32 = arith.constant 0 : index
        %c0_33 = arith.constant 0 : index
        %85 = vector.load %arg11[%c0_32, %c0_33] : memref<8x1xf32, #tpu.memory_space<vmem>>, vector<8x1xf32>
        tpu.vector_store %arg11[%c0_32, %c0_33], %84 {strides = array<i32>} : memref<8x1xf32, #tpu.memory_space<vmem>>, vector<8x1xf32>,
        %cst_34 = arith.constant 0.000000e+00 : f32
        %86 = vector.broadcast %cst_34 : f32 to vector<8x1xf32>
        %c0_35 = arith.constant 0 : index
        %c0_36 = arith.constant 0 : index
        %87 = vector.load %arg12[%c0_35, %c0_36] : memref<8x1xf32, #tpu.memory_space<vmem>>, vector<8x1xf32>
        tpu.vector_store %arg12[%c0_35, %c0_36], %86 {strides = array<i32>} : memref<8x1xf32, #tpu.memory_space<vmem>>, vector<8x1xf32>,
      } else {
      }
      %c0_7 = arith.constant 0 : index
      %c0_8 = arith.constant 0 : index
      %23 = vector.load %arg4[%c0_7, %c0_8] : memref<17x5xf32, #tpu.memory_space<vmem>>, vector<17x5xf32>
      %24 = vector.extract_strided_slice %23 {offsets = [0, 0], sizes = [8, 5], strides = [1, 1]} : vector<17x5xf32> to vector<8x5xf32>
      %c0_9 = arith.constant 0 : index
      %c0_10 = arith.constant 0 : index
      %25 = vector.load %arg3[%c0_9, %c0_10] : memref<5x128xf32, #tpu.memory_space<vmem>>, vector<5x128xf32>
      %26 = vector.extract_strided_slice %24 {offsets = [0, 0], sizes = [8, 1], strides = [1, 1]} : vector<8x5xf32> to vector<8x1xf32>
      %27 = vector.extract_strided_slice %25 {offsets = [0, 0], sizes = [1, 128], strides = [1, 1]} : vector<5x128xf32> to vector<1x128xf32>
      %28 = vector.broadcast %26 : vector<8x1xf32> to vector<8x128xf32>
      %29 = vector.broadcast %27 : vector<1x128xf32> to vector<8x128xf32>
      %30 = arith.mulf %28, %29 : vector<8x128xf32>
      %31 = vector.extract_strided_slice %24 {offsets = [0, 1], sizes = [8, 1], strides = [1, 1]} : vector<8x5xf32> to vector<8x1xf32>
      %32 = vector.extract_strided_slice %25 {offsets = [1, 0], sizes = [1, 128], strides = [1, 1]} : vector<5x128xf32> to vector<1x128xf32>
      %33 = vector.broadcast %31 : vector<8x1xf32> to vector<8x128xf32>
      %34 = vector.broadcast %32 : vector<1x128xf32> to vector<8x128xf32>
      %35 = arith.mulf %33, %34 : vector<8x128xf32>
      %36 = arith.addf %30, %35 : vector<8x128xf32>
      %37 = vector.extract_strided_slice %24 {offsets = [0, 2], sizes = [8, 1], strides = [1, 1]} : vector<8x5xf32> to vector<8x1xf32>
      %38 = vector.extract_strided_slice %25 {offsets = [2, 0], sizes = [1, 128], strides = [1, 1]} : vector<5x128xf32> to vector<1x128xf32>
      %39 = vector.broadcast %37 : vector<8x1xf32> to vector<8x128xf32>
      %40 = vector.broadcast %38 : vector<1x128xf32> to vector<8x128xf32>
      %41 = arith.mulf %39, %40 : vector<8x128xf32>
      %42 = arith.addf %36, %41 : vector<8x128xf32>
      %43 = vector.extract_strided_slice %24 {offsets = [0, 3], sizes = [8, 1], strides = [1, 1]} : vector<8x5xf32> to vector<8x1xf32>
      %44 = vector.extract_strided_slice %25 {offsets = [3, 0], sizes = [1, 128], strides = [1, 1]} : vector<5x128xf32> to vector<1x128xf32>
      %45 = vector.broadcast %43 : vector<8x1xf32> to vector<8x128xf32>
      %46 = vector.broadcast %44 : vector<1x128xf32> to vector<8x128xf32>
      %47 = arith.mulf %45, %46 : vector<8x128xf32>
      %48 = arith.addf %42, %47 : vector<8x128xf32>
      %49 = vector.extract_strided_slice %24 {offsets = [0, 4], sizes = [8, 1], strides = [1, 1]} : vector<8x5xf32> to vector<8x1xf32>
      %50 = vector.extract_strided_slice %25 {offsets = [4, 0], sizes = [1, 128], strides = [1, 1]} : vector<5x128xf32> to vector<1x128xf32>
      %51 = vector.broadcast %49 : vector<8x1xf32> to vector<8x128xf32>
      %52 = vector.broadcast %50 : vector<1x128xf32> to vector<8x128xf32>
      %53 = arith.mulf %51, %52 : vector<8x128xf32>
      %54 = arith.addf %48, %53 : vector<8x128xf32>
      %55 = vector.broadcast %4 : vector<8x1xf32> to vector<8x128xf32>
      %56 = arith.addf %54, %55 : vector<8x128xf32>
      %57 = tpu.iota {dimensions = array<i32: 1>} : vector<1x128xi32>
      %c128_i32 = arith.constant 128 : i32
      %58 = arith.muli %arg1, %c128_i32 : i32
      %59 = vector.broadcast %58 : i32 to vector<1x128xi32>
      %60 = arith.addi %57, %59 : vector<1x128xi32>
      %61 = vector.broadcast %0 : i32 to vector<1x128xi32>
      %62 = arith.cmpi slt, %60, %61 : vector<1x128xi32>
      %cst_11 = arith.constant 0.000000e+00 : f32
      %63 = vector.shape_cast %62 : vector<1x128xi1> to vector<1x128xi1>
      %64 = vector.broadcast %63 : vector<1x128xi1> to vector<8x128xi1>
      %65 = vector.broadcast %cst_11 : f32 to vector<8x128xf32>
      %66 = arith.select %64, %56, %65 : vector<8x128xi1>, vector<8x128xf32>
      %c0_12 = arith.constant 0 : index
      %c0_13 = arith.constant 0 : index
      %67 = vector.load %arg9[%c0_12, %c0_13] : memref<8x1xf32, #tpu.memory_space<vmem>>, vector<8x1xf32>
      %cst_14 = arith.constant dense<0.000000e+00> : vector<8xf32>
      %68 = vector.multi_reduction <add>, %66, %cst_14 [1] : vector<8x128xf32> to vector<8xf32>
      %69 = vector.shape_cast %68 : vector<8xf32> to vector<8x1xf32>
      %70 = arith.addf %67, %69 : vector<8x1xf32>
      %c0_15 = arith.constant 0 : index
      %c0_16 = arith.constant 0 : index
      %71 = vector.load %arg9[%c0_15, %c0_16] : memref<8x1xf32, #tpu.memory_space<vmem>>, vector<8x1xf32>
      tpu.vector_store %arg9[%c0_15, %c0_16], %70 {strides = array<i32>} : memref<8x1xf32, #tpu.memory_space<vmem>>, vector<8x1xf32>,
      %c0_17 = arith.constant 0 : index
      %c0_18 = arith.constant 0 : index
      %72 = vector.load %arg10[%c0_17, %c0_18] : memref<8x1xf32, #tpu.memory_space<vmem>>, vector<8x1xf32>
      %73 = arith.mulf %66, %66 : vector<8x128xf32>
      %cst_19 = arith.constant dense<0.000000e+00> : vector<8xf32>
      %74 = vector.multi_reduction <add>, %73, %cst_19 [1] : vector<8x128xf32> to vector<8xf32>
      %75 = vector.shape_cast %74 : vector<8xf32> to vector<8x1xf32>
      %76 = arith.addf %72, %75 : vector<8x1xf32>
      %c0_20 = arith.constant 0 : index
      %c0_21 = arith.constant 0 : index
      %77 = vector.load %arg10[%c0_20, %c0_21] : memref<8x1xf32, #tpu.memory_space<vmem>>, vector<8x1xf32>
      tpu.vector_store %arg10[%c0_20, %c0_21], %76 {strides = array<i32>} : memref<8x1xf32, #tpu.memory_space<vmem>>, vector<8x1xf32>,
      %cst_22 = arith.constant 0.000000e+00 : f32
      %78 = vector.broadcast %cst_22 : f32 to vector<1x128xf32>
      %c0_23 = arith.constant 0 : index
      %c0_24 = arith.constant 0 : index
      %79 = vector.load %arg8[%c0_23, %c0_24] : memref<1x128xf32, #tpu.memory_space<vmem>>, vector<1x128xf32>
      tpu.vector_store %arg8[%c0_23, %c0_24], %78 {strides = array<i32>} : memref<1x128xf32, #tpu.memory_space<vmem>>, vector<1x128xf32>,
    } else {
    }
    %c1_i32 = arith.constant 1 : i32
    %14 = arith.cmpi eq, %arg0, %c1_i32 : i32
    %15 = arith.extui %14 : i1 to i32
    %c0_i32_3 = arith.constant 0 : i32
    %16 = arith.cmpi ne, %15, %c0_i32_3 : i32
    scf.if %16 {
      %c0_i32_5 = arith.constant 0 : i32
      %20 = arith.cmpi eq, %arg1, %c0_i32_5 : i32
      %21 = arith.extui %20 : i1 to i32
      %c0_i32_6 = arith.constant 0 : i32
      %22 = arith.cmpi ne, %21, %c0_i32_6 : i32
      scf.if %22 {
        %c0_36 = arith.constant 0 : index
        %c0_37 = arith.constant 0 : index
        %152 = vector.load %arg9[%c0_36, %c0_37] : memref<8x1xf32, #tpu.memory_space<vmem>>, vector<8x1xf32>
        %153 = vector.broadcast %2 : f32 to vector<8x1xf32>
        %154 = arith.mulf %152, %153 : vector<8x1xf32>
        %c0_38 = arith.constant 0 : index
        %c0_39 = arith.constant 0 : index
        %155 = vector.load %arg10[%c0_38, %c0_39] : memref<8x1xf32, #tpu.memory_space<vmem>>, vector<8x1xf32>
        %156 = vector.broadcast %2 : f32 to vector<8x1xf32>
        %157 = arith.mulf %155, %156 : vector<8x1xf32>
        %158 = arith.mulf %154, %154 : vector<8x1xf32>
        %159 = arith.subf %157, %158 : vector<8x1xf32>
        %cst_40 = arith.constant 0.000000e+00 : f32
        %160 = vector.broadcast %cst_40 : f32 to vector<8x1xf32>
        %161 = arith.maximumf %159, %160 : vector<8x1xf32>
        %cst_41 = arith.constant 9.99999974E-6 : f32
        %162 = vector.broadcast %cst_41 : f32 to vector<8x1xf32>
        %163 = arith.addf %161, %162 : vector<8x1xf32>
        %164 = math.rsqrt %163 : vector<8x1xf32>
        %165 = arith.mulf %5, %164 : vector<8x1xf32>
        %c0_42 = arith.constant 0 : index
        %c0_43 = arith.constant 0 : index
        %166 = vector.load %arg9[%c0_42, %c0_43] : memref<8x1xf32, #tpu.memory_space<vmem>>, vector<8x1xf32>
        tpu.vector_store %arg9[%c0_42, %c0_43], %165 {strides = array<i32>} : memref<8x1xf32, #tpu.memory_space<vmem>>, vector<8x1xf32>,
        %167 = arith.mulf %154, %165 : vector<8x1xf32>
        %168 = arith.subf %6, %167 : vector<8x1xf32>
        %c0_44 = arith.constant 0 : index
        %c0_45 = arith.constant 0 : index
        %169 = vector.load %arg10[%c0_44, %c0_45] : memref<8x1xf32, #tpu.memory_space<vmem>>, vector<8x1xf32>
        tpu.vector_store %arg10[%c0_44, %c0_45], %168 {strides = array<i32>} : memref<8x1xf32, #tpu.memory_space<vmem>>, vector<8x1xf32>,
      } else {
      }
      %c0_7 = arith.constant 0 : index
      %c0_8 = arith.constant 0 : index
      %23 = vector.load %arg3[%c0_7, %c0_8] : memref<5x128xf32, #tpu.memory_space<vmem>>, vector<5x128xf32>
      %c0_9 = arith.constant 0 : index
      %c0_10 = arith.constant 0 : index
      %24 = vector.load %arg4[%c0_9, %c0_10] : memref<17x5xf32, #tpu.memory_space<vmem>>, vector<17x5xf32>
      %c0_11 = arith.constant 0 : index
      %c0_12 = arith.constant 0 : index
      %25 = vector.load %arg5[%c0_11, %c0_12] : memref<9x8xf32, #tpu.memory_space<vmem>>, vector<9x8xf32>
      %26 = vector.extract_strided_slice %24 {offsets = [0, 0], sizes = [17, 1], strides = [1, 1]} : vector<17x5xf32> to vector<17x1xf32>
      %27 = vector.extract_strided_slice %23 {offsets = [0, 0], sizes = [1, 128], strides = [1, 1]} : vector<5x128xf32> to vector<1x128xf32>
      %28 = vector.broadcast %26 : vector<17x1xf32> to vector<17x128xf32>
      %29 = vector.broadcast %27 : vector<1x128xf32> to vector<17x128xf32>
      %30 = arith.mulf %28, %29 : vector<17x128xf32>
      %31 = vector.extract_strided_slice %24 {offsets = [0, 1], sizes = [17, 1], strides = [1, 1]} : vector<17x5xf32> to vector<17x1xf32>
      %32 = vector.extract_strided_slice %23 {offsets = [1, 0], sizes = [1, 128], strides = [1, 1]} : vector<5x128xf32> to vector<1x128xf32>
      %33 = vector.broadcast %31 : vector<17x1xf32> to vector<17x128xf32>
      %34 = vector.broadcast %32 : vector<1x128xf32> to vector<17x128xf32>
      %35 = arith.mulf %33, %34 : vector<17x128xf32>
      %36 = arith.addf %30, %35 : vector<17x128xf32>
      %37 = vector.extract_strided_slice %24 {offsets = [0, 2], sizes = [17, 1], strides = [1, 1]} : vector<17x5xf32> to vector<17x1xf32>
      %38 = vector.extract_strided_slice %23 {offsets = [2, 0], sizes = [1, 128], strides = [1, 1]} : vector<5x128xf32> to vector<1x128xf32>
      %39 = vector.broadcast %37 : vector<17x1xf32> to vector<17x128xf32>
      %40 = vector.broadcast %38 : vector<1x128xf32> to vector<17x128xf32>
      %41 = arith.mulf %39, %40 : vector<17x128xf32>
      %42 = arith.addf %36, %41 : vector<17x128xf32>
      %43 = vector.extract_strided_slice %24 {offsets = [0, 3], sizes = [17, 1], strides = [1, 1]} : vector<17x5xf32> to vector<17x1xf32>
      %44 = vector.extract_strided_slice %23 {offsets = [3, 0], sizes = [1, 128], strides = [1, 1]} : vector<5x128xf32> to vector<1x128xf32>
      %45 = vector.broadcast %43 : vector<17x1xf32> to vector<17x128xf32>
      %46 = vector.broadcast %44 : vector<1x128xf32> to vector<17x128xf32>
      %47 = arith.mulf %45, %46 : vector<17x128xf32>
      %48 = arith.addf %42, %47 : vector<17x128xf32>
      %49 = vector.extract_strided_slice %24 {offsets = [0, 4], sizes = [17, 1], strides = [1, 1]} : vector<17x5xf32> to vector<17x1xf32>
      %50 = vector.extract_strided_slice %23 {offsets = [4, 0], sizes = [1, 128], strides = [1, 1]} : vector<5x128xf32> to vector<1x128xf32>
      %51 = vector.broadcast %49 : vector<17x1xf32> to vector<17x128xf32>
      %52 = vector.broadcast %50 : vector<1x128xf32> to vector<17x128xf32>
      %53 = arith.mulf %51, %52 : vector<17x128xf32>
      %54 = arith.addf %48, %53 : vector<17x128xf32>
      %55 = vector.extract_strided_slice %54 {offsets = [0, 0], sizes = [8, 128], strides = [1, 1]} : vector<17x128xf32> to vector<8x128xf32>
      %56 = vector.broadcast %4 : vector<8x1xf32> to vector<8x128xf32>
      %57 = arith.addf %55, %56 : vector<8x128xf32>
      %c0_13 = arith.constant 0 : index
      %c0_14 = arith.constant 0 : index
      %58 = vector.load %arg9[%c0_13, %c0_14] : memref<8x1xf32, #tpu.memory_space<vmem>>, vector<8x1xf32>
      %59 = vector.broadcast %58 : vector<8x1xf32> to vector<8x128xf32>
      %60 = arith.mulf %57, %59 : vector<8x128xf32>
      %c0_15 = arith.constant 0 : index
      %c0_16 = arith.constant 0 : index
      %61 = vector.load %arg10[%c0_15, %c0_16] : memref<8x1xf32, #tpu.memory_space<vmem>>, vector<8x1xf32>
      %62 = vector.broadcast %61 : vector<8x1xf32> to vector<8x128xf32>
      %63 = arith.addf %60, %62 : vector<8x128xf32>
      %cst_17 = arith.constant 0.000000e+00 : f32
      %64 = vector.broadcast %cst_17 : f32 to vector<8x128xf32>
      %65 = arith.maximumf %63, %64 : vector<8x128xf32>
      %66 = vector.extract_strided_slice %25 {offsets = [0, 0], sizes = [9, 1], strides = [1, 1]} : vector<9x8xf32> to vector<9x1xf32>
      %67 = vector.extract_strided_slice %65 {offsets = [0, 0], sizes = [1, 128], strides = [1, 1]} : vector<8x128xf32> to vector<1x128xf32>
      %68 = vector.broadcast %66 : vector<9x1xf32> to vector<9x128xf32>
      %69 = vector.broadcast %67 : vector<1x128xf32> to vector<9x128xf32>
      %70 = arith.mulf %68, %69 : vector<9x128xf32>
      %71 = vector.extract_strided_slice %25 {offsets = [0, 1], sizes = [9, 1], strides = [1, 1]} : vector<9x8xf32> to vector<9x1xf32>
      %72 = vector.extract_strided_slice %65 {offsets = [1, 0], sizes = [1, 128], strides = [1, 1]} : vector<8x128xf32> to vector<1x128xf32>
      %73 = vector.broadcast %71 : vector<9x1xf32> to vector<9x128xf32>
      %74 = vector.broadcast %72 : vector<1x128xf32> to vector<9x128xf32>
      %75 = arith.mulf %73, %74 : vector<9x128xf32>
      %76 = arith.addf %70, %75 : vector<9x128xf32>
      %77 = vector.extract_strided_slice %25 {offsets = [0, 2], sizes = [9, 1], strides = [1, 1]} : vector<9x8xf32> to vector<9x1xf32>
      %78 = vector.extract_strided_slice %65 {offsets = [2, 0], sizes = [1, 128], strides = [1, 1]} : vector<8x128xf32> to vector<1x128xf32>
      %79 = vector.broadcast %77 : vector<9x1xf32> to vector<9x128xf32>
      %80 = vector.broadcast %78 : vector<1x128xf32> to vector<9x128xf32>
      %81 = arith.mulf %79, %80 : vector<9x128xf32>
      %82 = arith.addf %76, %81 : vector<9x128xf32>
      %83 = vector.extract_strided_slice %25 {offsets = [0, 3], sizes = [9, 1], strides = [1, 1]} : vector<9x8xf32> to vector<9x1xf32>
      %84 = vector.extract_strided_slice %65 {offsets = [3, 0], sizes = [1, 128], strides = [1, 1]} : vector<8x128xf32> to vector<1x128xf32>
      %85 = vector.broadcast %83 : vector<9x1xf32> to vector<9x128xf32>
      %86 = vector.broadcast %84 : vector<1x128xf32> to vector<9x128xf32>
      %87 = arith.mulf %85, %86 : vector<9x128xf32>
      %88 = arith.addf %82, %87 : vector<9x128xf32>
      %89 = vector.extract_strided_slice %25 {offsets = [0, 4], sizes = [9, 1], strides = [1, 1]} : vector<9x8xf32> to vector<9x1xf32>
      %90 = vector.extract_strided_slice %65 {offsets = [4, 0], sizes = [1, 128], strides = [1, 1]} : vector<8x128xf32> to vector<1x128xf32>
      %91 = vector.broadcast %89 : vector<9x1xf32> to vector<9x128xf32>
      %92 = vector.broadcast %90 : vector<1x128xf32> to vector<9x128xf32>
      %93 = arith.mulf %91, %92 : vector<9x128xf32>
      %94 = arith.addf %88, %93 : vector<9x128xf32>
      %95 = vector.extract_strided_slice %25 {offsets = [0, 5], sizes = [9, 1], strides = [1, 1]} : vector<9x8xf32> to vector<9x1xf32>
      %96 = vector.extract_strided_slice %65 {offsets = [5, 0], sizes = [1, 128], strides = [1, 1]} : vector<8x128xf32> to vector<1x128xf32>
      %97 = vector.broadcast %95 : vector<9x1xf32> to vector<9x128xf32>
      %98 = vector.broadcast %96 : vector<1x128xf32> to vector<9x128xf32>
      %99 = arith.mulf %97, %98 : vector<9x128xf32>
      %100 = arith.addf %94, %99 : vector<9x128xf32>
      %101 = vector.extract_strided_slice %25 {offsets = [0, 6], sizes = [9, 1], strides = [1, 1]} : vector<9x8xf32> to vector<9x1xf32>
      %102 = vector.extract_strided_slice %65 {offsets = [6, 0], sizes = [1, 128], strides = [1, 1]} : vector<8x128xf32> to vector<1x128xf32>
      %103 = vector.broadcast %101 : vector<9x1xf32> to vector<9x128xf32>
      %104 = vector.broadcast %102 : vector<1x128xf32> to vector<9x128xf32>
      %105 = arith.mulf %103, %104 : vector<9x128xf32>
      %106 = arith.addf %100, %105 : vector<9x128xf32>
      %107 = vector.extract_strided_slice %25 {offsets = [0, 7], sizes = [9, 1], strides = [1, 1]} : vector<9x8xf32> to vector<9x1xf32>
      %108 = vector.extract_strided_slice %65 {offsets = [7, 0], sizes = [1, 128], strides = [1, 1]} : vector<8x128xf32> to vector<1x128xf32>
      %109 = vector.broadcast %107 : vector<9x1xf32> to vector<9x128xf32>
      %110 = vector.broadcast %108 : vector<1x128xf32> to vector<9x128xf32>
      %111 = arith.mulf %109, %110 : vector<9x128xf32>
      %112 = arith.addf %106, %111 : vector<9x128xf32>
      %113 = vector.extract_strided_slice %54 {offsets = [8, 0], sizes = [8, 128], strides = [1, 1]} : vector<17x128xf32> to vector<8x128xf32>
      %114 = vector.extract_strided_slice %112 {offsets = [0, 0], sizes = [8, 128], strides = [1, 1]} : vector<9x128xf32> to vector<8x128xf32>
      %115 = arith.addf %113, %114 : vector<8x128xf32>
      %116 = vector.broadcast %7 : vector<8x1xf32> to vector<8x128xf32>
      %117 = arith.addf %115, %116 : vector<8x128xf32>
      %118 = tpu.iota {dimensions = array<i32: 1>} : vector<1x128xi32>
      %c128_i32 = arith.constant 128 : i32
      %119 = arith.muli %arg1, %c128_i32 : i32
      %120 = vector.broadcast %119 : i32 to vector<1x128xi32>
      %121 = arith.addi %118, %120 : vector<1x128xi32>
      %122 = vector.broadcast %0 : i32 to vector<1x128xi32>
      %123 = arith.cmpi slt, %121, %122 : vector<1x128xi32>
      %cst_18 = arith.constant 0.000000e+00 : f32
      %124 = vector.shape_cast %123 : vector<1x128xi1> to vector<1x128xi1>
      %125 = vector.broadcast %124 : vector<1x128xi1> to vector<8x128xi1>
      %126 = vector.broadcast %cst_18 : f32 to vector<8x128xf32>
      %127 = arith.select %125, %117, %126 : vector<8x128xi1>, vector<8x128xf32>
      %c0_19 = arith.constant 0 : index
      %c0_20 = arith.constant 0 : index
      %128 = vector.load %arg11[%c0_19, %c0_20] : memref<8x1xf32, #tpu.memory_space<vmem>>, vector<8x1xf32>
      %cst_21 = arith.constant dense<0.000000e+00> : vector<8xf32>
      %129 = vector.multi_reduction <add>, %127, %cst_21 [1] : vector<8x128xf32> to vector<8xf32>
      %130 = vector.shape_cast %129 : vector<8xf32> to vector<8x1xf32>
      %131 = arith.addf %128, %130 : vector<8x1xf32>
      %c0_22 = arith.constant 0 : index
      %c0_23 = arith.constant 0 : index
      %132 = vector.load %arg11[%c0_22, %c0_23] : memref<8x1xf32, #tpu.memory_space<vmem>>, vector<8x1xf32>
      tpu.vector_store %arg11[%c0_22, %c0_23], %131 {strides = array<i32>} : memref<8x1xf32, #tpu.memory_space<vmem>>, vector<8x1xf32>,
      %c0_24 = arith.constant 0 : index
      %c0_25 = arith.constant 0 : index
      %133 = vector.load %arg12[%c0_24, %c0_25] : memref<8x1xf32, #tpu.memory_space<vmem>>, vector<8x1xf32>
      %134 = arith.mulf %127, %127 : vector<8x128xf32>
      %cst_26 = arith.constant dense<0.000000e+00> : vector<8xf32>
      %135 = vector.multi_reduction <add>, %134, %cst_26 [1] : vector<8x128xf32> to vector<8xf32>
      %136 = vector.shape_cast %135 : vector<8xf32> to vector<8x1xf32>
      %137 = arith.addf %133, %136 : vector<8x1xf32>
      %c0_27 = arith.constant 0 : index
      %c0_28 = arith.constant 0 : index
      %138 = vector.load %arg12[%c0_27, %c0_28] : memref<8x1xf32, #tpu.memory_space<vmem>>, vector<8x1xf32>
      tpu.vector_store %arg12[%c0_27, %c0_28], %137 {strides = array<i32>} : memref<8x1xf32, #tpu.memory_space<vmem>>, vector<8x1xf32>,
      %139 = arith.index_cast %arg1 : i32 to index
      %c0_29 = arith.constant 0 : index
      %c0_30 = arith.constant 0 : index
      %140 = vector.load %arg13[%139, %c0_29, %c0_30] : memref<1x8x128xf32, #tpu.memory_space<vmem>>, vector<1x8x128xf32>
      %141 = vector.shape_cast %140 : vector<1x8x128xf32> to vector<8x128xf32>
      %142 = vector.shape_cast %117 : vector<8x128xf32> to vector<1x8x128xf32>
      tpu.vector_store %arg13[%139, %c0_29, %c0_30], %142 {strides = array<i32>} : memref<1x8x128xf32, #tpu.memory_space<vmem>>, vector<1x8x128xf32>,
      %143 = vector.extract_strided_slice %54 {offsets = [16, 0], sizes = [1, 128], strides = [1, 1]} : vector<17x128xf32> to vector<1x128xf32>
      %144 = vector.extract_strided_slice %112 {offsets = [8, 0], sizes = [1, 128], strides = [1, 1]} : vector<9x128xf32> to vector<1x128xf32>
      %145 = arith.addf %143, %144 : vector<1x128xf32>
      %146 = arith.index_cast %arg1 : i32 to index
      %c0_31 = arith.constant 0 : index
      %c0_32 = arith.constant 0 : index
      %147 = vector.load %arg14[%146, %c0_31, %c0_32] : memref<1x1x128xf32, #tpu.memory_space<vmem>>, vector<1x1x128xf32>
      %148 = vector.shape_cast %147 : vector<1x1x128xf32> to vector<1x128xf32>
      %149 = vector.shape_cast %145 : vector<1x128xf32> to vector<1x1x128xf32>
      tpu.vector_store %arg14[%146, %c0_31, %c0_32], %149 {strides = array<i32>} : memref<1x1x128xf32, #tpu.memory_space<vmem>>, vector<1x1x128xf32>,
      %cst_33 = arith.constant 0.000000e+00 : f32
      %150 = vector.broadcast %cst_33 : f32 to vector<1x128xf32>
      %c0_34 = arith.constant 0 : index
      %c0_35 = arith.constant 0 : index
      %151 = vector.load %arg8[%c0_34, %c0_35] : memref<1x128xf32, #tpu.memory_space<vmem>>, vector<1x128xf32>
      tpu.vector_store %arg8[%c0_34, %c0_35], %150 {strides = array<i32>} : memref<1x128xf32, #tpu.memory_space<vmem>>, vector<1x128xf32>,
    } else {
    }
    %c2_i32 = arith.constant 2 : i32
    %17 = arith.cmpi eq, %arg0, %c2_i32 : i32
    %18 = arith.extui %17 : i1 to i32
    %c0_i32_4 = arith.constant 0 : i32
    %19 = arith.cmpi ne, %18, %c0_i32_4 : i32
    scf.if %19 {
      %c0_i32_5 = arith.constant 0 : i32
      %20 = arith.cmpi eq, %arg1, %c0_i32_5 : i32
      %21 = arith.extui %20 : i1 to i32
      %c0_i32_6 = arith.constant 0 : i32
      %22 = arith.cmpi ne, %21, %c0_i32_6 : i32
      scf.if %22 {
        %c0_21 = arith.constant 0 : index
        %c0_22 = arith.constant 0 : index
        %86 = vector.load %arg11[%c0_21, %c0_22] : memref<8x1xf32, #tpu.memory_space<vmem>>, vector<8x1xf32>
        %87 = vector.broadcast %2 : f32 to vector<8x1xf32>
        %88 = arith.mulf %86, %87 : vector<8x1xf32>
        %c0_23 = arith.constant 0 : index
        %c0_24 = arith.constant 0 : index
        %89 = vector.load %arg12[%c0_23, %c0_24] : memref<8x1xf32, #tpu.memory_space<vmem>>, vector<8x1xf32>
        %90 = vector.broadcast %2 : f32 to vector<8x1xf32>
        %91 = arith.mulf %89, %90 : vector<8x1xf32>
        %92 = arith.mulf %88, %88 : vector<8x1xf32>
        %93 = arith.subf %91, %92 : vector<8x1xf32>
        %cst_25 = arith.constant 0.000000e+00 : f32
        %94 = vector.broadcast %cst_25 : f32 to vector<8x1xf32>
        %95 = arith.maximumf %93, %94 : vector<8x1xf32>
        %cst_26 = arith.constant 9.99999974E-6 : f32
        %96 = vector.broadcast %cst_26 : f32 to vector<8x1xf32>
        %97 = arith.addf %95, %96 : vector<8x1xf32>
        %98 = math.rsqrt %97 : vector<8x1xf32>
        %99 = arith.mulf %8, %98 : vector<8x1xf32>
        %c0_27 = arith.constant 0 : index
        %c0_28 = arith.constant 0 : index
        %100 = vector.load %arg11[%c0_27, %c0_28] : memref<8x1xf32, #tpu.memory_space<vmem>>, vector<8x1xf32>
        tpu.vector_store %arg11[%c0_27, %c0_28], %99 {strides = array<i32>} : memref<8x1xf32, #tpu.memory_space<vmem>>, vector<8x1xf32>,
        %101 = arith.mulf %88, %99 : vector<8x1xf32>
        %102 = arith.subf %9, %101 : vector<8x1xf32>
        %c0_29 = arith.constant 0 : index
        %c0_30 = arith.constant 0 : index
        %103 = vector.load %arg12[%c0_29, %c0_30] : memref<8x1xf32, #tpu.memory_space<vmem>>, vector<8x1xf32>
        tpu.vector_store %arg12[%c0_29, %c0_30], %102 {strides = array<i32>} : memref<8x1xf32, #tpu.memory_space<vmem>>, vector<8x1xf32>,
      } else {
      }
      %23 = arith.index_cast %arg1 : i32 to index
      %c0_7 = arith.constant 0 : index
      %c0_8 = arith.constant 0 : index
      %24 = vector.load %arg13[%23, %c0_7, %c0_8] : memref<1x8x128xf32, #tpu.memory_space<vmem>>, vector<1x8x128xf32>
      %25 = vector.shape_cast %24 : vector<1x8x128xf32> to vector<8x128xf32>
      %26 = arith.index_cast %arg1 : i32 to index
      %c0_9 = arith.constant 0 : index
      %c0_10 = arith.constant 0 : index
      %27 = vector.load %arg14[%26, %c0_9, %c0_10] : memref<1x1x128xf32, #tpu.memory_space<vmem>>, vector<1x1x128xf32>
      %28 = vector.shape_cast %27 : vector<1x1x128xf32> to vector<1x128xf32>
      %c0_11 = arith.constant 0 : index
      %c0_12 = arith.constant 0 : index
      %29 = vector.load %arg11[%c0_11, %c0_12] : memref<8x1xf32, #tpu.memory_space<vmem>>, vector<8x1xf32>
      %30 = vector.broadcast %29 : vector<8x1xf32> to vector<8x128xf32>
      %31 = arith.mulf %25, %30 : vector<8x128xf32>
      %c0_13 = arith.constant 0 : index
      %c0_14 = arith.constant 0 : index
      %32 = vector.load %arg12[%c0_13, %c0_14] : memref<8x1xf32, #tpu.memory_space<vmem>>, vector<8x1xf32>
      %33 = vector.broadcast %32 : vector<8x1xf32> to vector<8x128xf32>
      %34 = arith.addf %31, %33 : vector<8x128xf32>
      %cst_15 = arith.constant 0.000000e+00 : f32
      %35 = vector.broadcast %cst_15 : f32 to vector<8x128xf32>
      %36 = arith.maximumf %34, %35 : vector<8x128xf32>
      %c0_16 = arith.constant 0 : index
      %c0_17 = arith.constant 0 : index
      %37 = vector.load %arg6[%c0_16, %c0_17] : memref<1x8xf32, #tpu.memory_space<vmem>>, vector<1x8xf32>
      %38 = vector.extract_strided_slice %37 {offsets = [0, 0], sizes = [1, 1], strides = [1, 1]} : vector<1x8xf32> to vector<1x1xf32>
      %39 = vector.extract_strided_slice %36 {offsets = [0, 0], sizes = [1, 128], strides = [1, 1]} : vector<8x128xf32> to vector<1x128xf32>
      %40 = vector.broadcast %38 : vector<1x1xf32> to vector<1x128xf32>
      %41 = arith.mulf %40, %39 : vector<1x128xf32>
      %42 = vector.extract_strided_slice %37 {offsets = [0, 1], sizes = [1, 1], strides = [1, 1]} : vector<1x8xf32> to vector<1x1xf32>
      %43 = vector.extract_strided_slice %36 {offsets = [1, 0], sizes = [1, 128], strides = [1, 1]} : vector<8x128xf32> to vector<1x128xf32>
      %44 = vector.broadcast %42 : vector<1x1xf32> to vector<1x128xf32>
      %45 = arith.mulf %44, %43 : vector<1x128xf32>
      %46 = arith.addf %41, %45 : vector<1x128xf32>
      %47 = vector.extract_strided_slice %37 {offsets = [0, 2], sizes = [1, 1], strides = [1, 1]} : vector<1x8xf32> to vector<1x1xf32>
      %48 = vector.extract_strided_slice %36 {offsets = [2, 0], sizes = [1, 128], strides = [1, 1]} : vector<8x128xf32> to vector<1x128xf32>
      %49 = vector.broadcast %47 : vector<1x1xf32> to vector<1x128xf32>
      %50 = arith.mulf %49, %48 : vector<1x128xf32>
      %51 = arith.addf %46, %50 : vector<1x128xf32>
      %52 = vector.extract_strided_slice %37 {offsets = [0, 3], sizes = [1, 1], strides = [1, 1]} : vector<1x8xf32> to vector<1x1xf32>
      %53 = vector.extract_strided_slice %36 {offsets = [3, 0], sizes = [1, 128], strides = [1, 1]} : vector<8x128xf32> to vector<1x128xf32>
      %54 = vector.broadcast %52 : vector<1x1xf32> to vector<1x128xf32>
      %55 = arith.mulf %54, %53 : vector<1x128xf32>
      %56 = arith.addf %51, %55 : vector<1x128xf32>
      %57 = vector.extract_strided_slice %37 {offsets = [0, 4], sizes = [1, 1], strides = [1, 1]} : vector<1x8xf32> to vector<1x1xf32>
      %58 = vector.extract_strided_slice %36 {offsets = [4, 0], sizes = [1, 128], strides = [1, 1]} : vector<8x128xf32> to vector<1x128xf32>
      %59 = vector.broadcast %57 : vector<1x1xf32> to vector<1x128xf32>
      %60 = arith.mulf %59, %58 : vector<1x128xf32>
      %61 = arith.addf %56, %60 : vector<1x128xf32>
      %62 = vector.extract_strided_slice %37 {offsets = [0, 5], sizes = [1, 1], strides = [1, 1]} : vector<1x8xf32> to vector<1x1xf32>
      %63 = vector.extract_strided_slice %36 {offsets = [5, 0], sizes = [1, 128], strides = [1, 1]} : vector<8x128xf32> to vector<1x128xf32>
      %64 = vector.broadcast %62 : vector<1x1xf32> to vector<1x128xf32>
      %65 = arith.mulf %64, %63 : vector<1x128xf32>
      %66 = arith.addf %61, %65 : vector<1x128xf32>
      %67 = vector.extract_strided_slice %37 {offsets = [0, 6], sizes = [1, 1], strides = [1, 1]} : vector<1x8xf32> to vector<1x1xf32>
      %68 = vector.extract_strided_slice %36 {offsets = [6, 0], sizes = [1, 128], strides = [1, 1]} : vector<8x128xf32> to vector<1x128xf32>
      %69 = vector.broadcast %67 : vector<1x1xf32> to vector<1x128xf32>
      %70 = arith.mulf %69, %68 : vector<1x128xf32>
      %71 = arith.addf %66, %70 : vector<1x128xf32>
      %72 = vector.extract_strided_slice %37 {offsets = [0, 7], sizes = [1, 1], strides = [1, 1]} : vector<1x8xf32> to vector<1x1xf32>
      %73 = vector.extract_strided_slice %36 {offsets = [7, 0], sizes = [1, 128], strides = [1, 1]} : vector<8x128xf32> to vector<1x128xf32>
      %74 = vector.broadcast %72 : vector<1x1xf32> to vector<1x128xf32>
      %75 = arith.mulf %74, %73 : vector<1x128xf32>
      %76 = arith.addf %71, %75 : vector<1x128xf32>
      %77 = arith.addf %28, %76 : vector<1x128xf32>
      %78 = vector.broadcast %10 : vector<1x1xf32> to vector<1x128xf32>
      %79 = arith.addf %77, %78 : vector<1x128xf32>
      %80 = arith.negf %79 : vector<1x128xf32>
      %81 = math.exp %80 : vector<1x128xf32>
      %cst_18 = arith.constant 1.000000e+00 : f32
      %82 = vector.broadcast %cst_18 : f32 to vector<1x128xf32>
      %83 = arith.addf %82, %81 : vector<1x128xf32>
      %84 = arith.divf %82, %83 : vector<1x128xf32>
      %c0_19 = arith.constant 0 : index
      %c0_20 = arith.constant 0 : index
      %85 = vector.load %arg8[%c0_19, %c0_20] : memref<1x128xf32, #tpu.memory_space<vmem>>, vector<1x128xf32>
      tpu.vector_store %arg8[%c0_19, %c0_20], %84 {strides = array<i32>} : memref<1x128xf32, #tpu.memory_space<vmem>>, vector<1x128xf32>,
    } else {
    }
    return
  }
  func.func @transform_0(%arg0: i32, %arg1: i32, %arg2: memref<1xi32, #tpu.memory_space<smem>>) -> (i32, i32) {
    %c0_i32 = arith.constant 0 : i32
    %c0_i32_0 = arith.constant 0 : i32
    return %c0_i32, %arg1 : i32, i32
  }
  func.func @transform_1(%arg0: i32, %arg1: i32, %arg2: memref<1xi32, #tpu.memory_space<smem>>) -> (i32, i32) {
    %c0_i32 = arith.constant 0 : i32
    %c0_i32_0 = arith.constant 0 : i32
    %c0_i32_1 = arith.constant 0 : i32
    return %c0_i32, %c0_i32_0 : i32, i32
  }
  func.func @transform_2(%arg0: i32, %arg1: i32, %arg2: memref<1xi32, #tpu.memory_space<smem>>) -> (i32, i32) {
    %c0_i32 = arith.constant 0 : i32
    %c0_i32_0 = arith.constant 0 : i32
    %c0_i32_1 = arith.constant 0 : i32
    return %c0_i32, %c0_i32_0 : i32, i32
  }
  func.func @transform_3(%arg0: i32, %arg1: i32, %arg2: memref<1xi32, #tpu.memory_space<smem>>) -> (i32, i32) {
    %c0_i32 = arith.constant 0 : i32
    %c0_i32_0 = arith.constant 0 : i32
    %c0_i32_1 = arith.constant 0 : i32
    return %c0_i32, %c0_i32_0 : i32, i32
  }
  func.func @transform_4(%arg0: i32, %arg1: i32, %arg2: memref<1xi32, #tpu.memory_space<smem>>) -> (i32, i32) {
    %c0_i32 = arith.constant 0 : i32
    %c0_i32_0 = arith.constant 0 : i32
    %c0_i32_1 = arith.constant 0 : i32
    return %c0_i32, %c0_i32_0 : i32, i32
  }
  func.func @transform_5(%arg0: i32, %arg1: i32, %arg2: memref<1xi32, #tpu.memory_space<smem>>) -> (i32, i32) {
    %c0_i32 = arith.constant 0 : i32
    %c0_i32_0 = arith.constant 0 : i32
    return %c0_i32, %arg1 : i32, i32
  }
}

</mosaic_0001>

<bundles_post_ra>
// kernel: tpu_custom_call.1
= control target key start
LH: loop header
LB: loop body
LE: loop exit
PB: predicated region body
PF: predicated region fallthrough
CT: control target
= control target key end

     0   :  { %s1293_s0 = inlined_call_operand.<no memory space> [shape: s32[1], index: 0, kind: input, shape index: {}]   ;;  %s1294_s1 = inlined_call_operand.vmem [shape: f32[5,128], index: 1, kind: input, shape index: {}]   ;;  %s1295_s2 = inlined_call_operand.vmem [shape: f32[17,5], index: 2, kind: input, shape index: {}]   ;;  %s1296_s3 = inlined_call_operand.vmem [shape: f32[9,8], index: 3, kind: input, shape index: {}]   ;;  %s1297_s4 = inlined_call_operand.vmem [shape: f32[1,8], index: 4, kind: input, shape index: {}]   ;;  %s1298_s5 = inlined_call_operand.vmem [shape: f32[8,7], index: 5, kind: input, shape index: {}]   ;;  %s1299_s6 = inlined_call_operand.hbm [shape: f32[1,128], index: 6, kind: output, shape index: {}]  }
   0x1   :  { %11 = sst [smem:[#allocation9]] %s1293_s0 }
   0x2   :  { %12 = vsyncpa [#allocation11], 0  ;;  %s1135_s23 = smov 0   ;;  %s1137_s24 = smov 0  }
   0x3   :  { %s1139_s25 = smov 0  }
   0x4 LB: > { %s877_s0 = sadd.s32 4294967295, %s1063_s25   ;;  %s30_s26 = sadd.s32 1, %s1059_s24  ;;  %s1063_s25 = sphi %s1139_s25, %s18_s25   ;;  %s1059_s24 = sphi %s1137_s24, %s1301_s24   ;;  %s1055_s23 = sphi %s1135_s23, %s1300_s23  }
   0x5   : > { %p32_p0 = scmp.ge.s32.totalorder %s30_s26, 3  ;;  %p880_p1 = scmp.ge.s32.totalorder %s1063_s25, 1 }
   0x6   : > { %p201_p2 = scmp.lt.s32.totalorder %s1063_s25, 4 }
   0x7   : > { %s1303_s26 = smov (%p32_p0, %s30_s26), 0 }
   0x8   : > { %p202_p3 = pnand %p880_p1, %p201_p2 }
   0x9   : > { %s1156_s27 = sld [smem:[#allocation9]] (!%p202_p3)  ;;  %p881_p4 = scmp.ne.s32.totalorder (!%p202_p3), %s1055_s23, 0 }
   0xa   : > { %205 = sbr.rel (%p202_p3) target bundleno = 1784 (0x6f8), region = 40 }
   0xf   : > { %s228_s28 = scvt.s32.f32 %s1156_s27  ;;  %v1162_v11 = vld [vmem:[%s1298_s5] sm:$0xff] }
  0x11   : > { %v229_v0 = vstv %s228_s28 }
  0x12   : > { %953 = vrcp.f32 %v229_v0  ;;  %v241_v3 = vand.u32 2147483648, %v229_v0  ;;  %vm235_vm0 = vweird.f32 %v229_v0  ;;  %v239_v5 = vand.u32 2147483647, %v229_v0 }
  0x14   : > { %v242_v7 = vor.u32 1.1754944e-38, %v241_v3  ;;  %vm240_vm3 = vcmp.eq.f32.partialorder %v239_v5, 8.507059e+37 }
  0x18   : > { %v954_v1 = vpop.eup %953 }
  0x19   : > { %v231_v2 = vmul.f32 %v954_v1, %v229_v0  ;;  %vm236_vm1 = vweird.f32 %v954_v1 }
  0x1a   : > { %vm237_vm2 = vmor %vm235_vm0, %vm236_vm1 }
  0x1b   : > { %v232_v4 = vsub.f32 1.0, %v231_v2 }
  0x1d   : > { %v233_v6 = vmul.f32 %v954_v1, %v232_v4 }
  0x1f   : > { %v234_v8 = vadd.f32 %v954_v1, %v233_v6 }
  0x21   : > { %v238_v9 = vsel %vm237_vm2, %v954_v1, %v234_v8 }
  0x22   : > { %v243_v10 = vsel %vm240_vm3, %v242_v7, %v238_v9 }
  0x23   : > { %889 = vpush %v243_v10 }
  0x50   : > { %249 = sbr.rel (%p881_p4) target bundleno = 345 (0x159), region = 44 }
  0x54   : > { %s1164_s7 = spop %889 }
  0x55   : > { %v259_v12 = vld [vmem:[%s1295_s2] sm:$0xff]  ;;  %v1065_v13 = vmov 0   ;;  %v1066_v14 = vmov 2   ;;  %v1067_v15 = vmov 4   ;;  %v1068_v16 = vmov 1  }
  0x56   : > { %955 = vset.pattern.permute.xlu0 %v1065_v13  ;;  %957 = vset.pattern.permute.xlu1 %v1066_v14  ;;  %v1069_v17 = vmov 3   ;;  %v260_v20 = vld [vmem:[%s1294_s1] sm:$0x1f]  ;;  %v302_v30 = vlaneseq  ;;  %v307_v39 = vstv %s1156_s27  ;;  %vm254_vm5 = vcmask 7168  }
  0x57   : > { %263 = vperm.xlu0 %955, %v259_v12   ;;  %276 = vperm.xlu1 %957, %v259_v12   ;;  %v266_v21 = vperm.slane %v260_v20, 0  ;;  %v272_v22 = vperm.slane %v260_v20, 1  ;;  %v279_v24 = vperm.slane %v260_v20, 2  ;;  %v286_v25 = vperm.slane %v260_v20, 3 }
  0x58   : > { %959 = vset.pattern.permute.xlu2 %v1067_v15  ;;  %v293_v33 = vperm.slane %v260_v20, 4  ;;  %v303_v36 = vand.u32 127, %v302_v30  ;;  %v1070_v45 = vmov 0.0  }
  0x59   : > { %290 = vperm.xlu2 %959, %v259_v12   ;;  %255 = vst.msk [vmem:[#allocation2] sm:$0xff] %vm254_vm5, %v1070_v45 }
  0x5a   : > { %vm308_vm4 = vcmp.lt.s32.totalorder %v303_v36, %v307_v39  ;;  %257 = vst.msk [vmem:[#allocation4] sm:$0xff] %vm254_vm5, %v1070_v45 }
  0x5b   : > { %258 = vst.msk [vmem:[#allocation5] sm:$0xff] %vm254_vm5, %v1070_v45 }
  0x5c   : > { %324 = vst [vmem:[#allocation10] sm:$0x1] %v1070_v45 }
  0x5d   : > { %256 = vst.msk [vmem:[#allocation3] sm:$0xff] %vm254_vm5, %v1070_v45 }
  0x5f   : > { %956 = vset.pattern.permute.xlu0 %v1068_v16  ;;  %958 = vset.pattern.permute.xlu1 %v1069_v17 }
  0x60   : > { %269 = vperm.xlu0 %956, %v259_v12   ;;  %283 = vperm.xlu1 %958, %v259_v12   ;;  %v312_v46 = vld [vmem:[#allocation2] sm:$0xff] }
  0x61   : > { %960 = vset.pattern.permute.xlu2 %v1065_v13 }
  0x62   : > { %298 = vperm.xlu2 %960, %v1162_v11  }
  0x64   : > { %v318_v48 = vld [vmem:[#allocation3] sm:$0xff] }
  0x68   : > { %961 = vset.pattern.permute.xlu0 %v1065_v13 }
  0xb3   : > { %v291_v23 = vpop.permute.xlu2 %290 }
  0xb4   : > { %v294_v37 = vmul.f32 %v293_v33, %v291_v23 }
  0xbc   : > { %v299_v40 = vpop.permute.xlu2 %298 }
  0xc9   : > { %v264_v18 = vpop.permute.xlu0 %263  ;;  %v277_v19 = vpop.permute.xlu1 %276 }
  0xca   : > { %v267_v28 = vmul.f32 %v266_v21, %v264_v18  ;;  %v280_v31 = vmul.f32 %v279_v24, %v277_v19 }
  0xd2   : > { %v270_v26 = vpop.permute.xlu0 %269  ;;  %v284_v27 = vpop.permute.xlu1 %283 }
  0xd3   : > { %v273_v29 = vmul.f32 %v272_v22, %v270_v26  ;;  %v287_v34 = vmul.f32 %v286_v25, %v284_v27 }
  0xd5   : > { %v274_v32 = vadd.f32 %v273_v29, %v267_v28 }
  0xd7   : > { %v281_v35 = vadd.f32 %v280_v31, %v274_v32 }
  0xd9   : > { %v288_v38 = vadd.f32 %v287_v34, %v281_v35 }
  0xdb   : > { %v295_v41 = vadd.f32 %v294_v37, %v288_v38 }
  0xdd   : > { %v301_v42 = vadd.f32 %v299_v40, %v295_v41 }
  0xdf   : > { %v311_v43 = vsel %vm308_vm4, %v301_v42, 0.0 }
  0xe0   : > { %313 = vadd.xlane.f32.xlu1 %v311_v43  ;;  %v319_v44 = vmul.f32 %v311_v43, %v311_v43 }
  0xe2   : > { %320 = vadd.xlane.f32.xlu2 %v319_v44 }
 0x153   : > { %v314_v47 = vpop.xlane.xlu1 %313 }
 0x154   : > { %v315_v49 = vadd.f32 %v314_v47, %v312_v46 }
 0x155   : > { %v321_v50 = vpop.xlane.xlu2 %320 }
 0x156   : > { %317 = vst.msk [vmem:[#allocation2] sm:$0xff] %vm254_vm5, %v315_v49  ;;  %v322_v51 = vadd.f32 %v321_v50, %v318_v48 }
 0x158   : > { %323 = vst.msk [vmem:[#allocation3] sm:$0xff] %vm254_vm5, %v322_v51 }
 0x159 PF: > { %p882_p5 = scmp.ne.s32.totalorder %s1055_s23, 1 }
 0x15a   : > { %s1071_s12 = smov (!%p882_p5), 1   ;;  %s1075_s17 = smov (!%p882_p5), 127  }
 0x15b   : > { %328 = sbr.rel (%p882_p5) target bundleno = 1118 (0x45e), region = 52  ;;  %s1078_s22 = smov (!%p882_p5), 2  }
 0x15c   : > { %s1079_s28 = smov (!%p882_p5), 126  }
 0x160   : > { %v333_v52 = vld [vmem:[#allocation2] sm:$0xff]  ;;  %v334_v53 = vstv %s1164_s7  ;;  %v336_v54 = vld [vmem:[#allocation3] sm:$0xff]  ;;  %v1072_v5 = vmov 0   ;;  %v1073_v6 = vmov 2   ;;  %v1074_v7 = vmov 1  }
 0x161   : > { %v1177_v55 = vmul.f32 %v334_v53, %v333_v52  ;;  %v337_v56 = vmul.f32 %v336_v54, %v334_v53  ;;  %v375_v4 = vld [vmem:[%s1295_s2] sm:$0xff]  ;;  %962 = vset.pattern.permute.xlu2 %v1072_v5  ;;  %966 = vset.pattern.permute.xlu0 %v1073_v6  ;;  %v376_v8 = vld [vmem:[%s1295_s2 + $0x8] sm:$0xff]  ;;  %v1076_v12 = vmov 3   ;;  %v377_v13 = vld [vmem:[%s1295_s2 + $0x10] sm:$0x1]  ;;  %v1077_v14 = vmov 4  }
 0x162   : > { %382 = vperm.xlu2 %962, %v375_v4   ;;  %963 = vset.pattern.permute.xlu1 %v1074_v7  ;;  %v1201_v17 = vld [vmem:[%s1294_s1] sm:$0x1f]  ;;  %vm361_vm9 = vcmask 7168   ;;  %v379_v29 = vld [vmem:[%s1296_s3 + $0x8] sm:$0x1]  ;;  %v1080_v31 = vmov 6  }
 0x163   : > { %v338_v57 = vmul.f32 %v1177_v55, %v1177_v55  ;;  %v1204_v18 = vperm.slane %v1201_v17, 0  ;;  %v1208_v20 = vperm.slane %v1201_v17, 1  ;;  %v378_v30 = vld [vmem:[%s1296_s3] sm:$0xff]  ;;  %v1081_v32 = vmov 5  }
 0x164   : > { %v1082_v35 = vmov 7   ;;  %v430_v44 = vperm.slane %v1201_v17, 2  ;;  %v449_v45 = vperm.slane %v1201_v17, 3 }
 0x165   : > { %v339_v58 = vsub.f32 %v337_v56, %v338_v57 }
 0x167   : > { %v340_v59 = vmax.f32 %v339_v58, 0.0 }
 0x169   : > { %v341_v60 = vadd.f32 1e-05, %v340_v59 }
 0x16a   : > { %387 = vperm.xlu2 %962, %v376_v8  }
 0x16b   : > { %990 = vrsqrt.f32 %v341_v60  ;;  %vm348_vm6 = vweird.f32 %v341_v60 }
 0x171   : > { %v991_v61 = vpop.eup %990 }
 0x172   : > { %v343_v62 = vmul.f32 %v991_v61, %v341_v60  ;;  %vm349_vm7 = vweird.f32 %v991_v61  ;;  %964 = vset.pattern.permute.xlu2 %v1074_v7 }
 0x173   : > { %vm350_vm8 = vmor %vm348_vm6, %vm349_vm7  ;;  %404 = vperm.xlu2 %964, %v376_v8  }
 0x174   : > { %v344_v63 = vmul.f32 %v991_v61, %v343_v62 }
 0x176   : > { %v345_v0 = vmul.f32 0.5, %v344_v63 }
 0x178   : > { %v346_v1 = vsub.f32 1.5, %v345_v0 }
 0x17a   : > { %v347_v2 = vmul.f32 %v991_v61, %v346_v1 }
 0x17b   : > { %965 = vset.pattern.permute.xlu2 %v1073_v6 }
 0x17c   : > { %v351_v3 = vsel %vm350_vm8, %v991_v61, %v347_v2  ;;  %419 = vperm.xlu2 %965, %v375_v4  }
 0x17d   : > { %353 = vrot.lane.b32.xlu0 %v351_v3, %s1071_s12  ;;  %v1247_v3 = vperm.slane %v1201_v17, 4 }
 0x184   : > { %968 = vset.pattern.permute.xlu2 %v1076_v12 }
 0x185   : > { %438 = vperm.xlu2 %968, %v375_v4  }
 0x18d   : > { %446 = vperm.xlu2 %968, %v377_v13  }
 0x195   : > { %973 = vset.pattern.permute.xlu2 %v1077_v14 }
 0x196   : > { %465 = vperm.xlu2 %973, %v377_v13  }
 0x19e   : > { %975 = vset.pattern.permute.xlu2 %v1072_v5 }
 0x1bc   : > { %v1196_v15 = vpop.permute.xlu2 %382 }
 0x1bd   : > { %v396_v60 = vmul.f32 %v1204_v18, %v1196_v15 }
 0x1c4   : > { %v388_v16 = vpop.permute.xlu2 %387 }
 0x1c5   : > { %v397_v19 = vmul.f32 %v1204_v18, %v388_v16 }
 0x1cd   : > { %v405_v21 = vpop.permute.xlu2 %404 }
 0x1ce   : > { %v413_v22 = vmul.f32 %v1208_v20, %v405_v21 }
 0x1d0   : > { %v1211_v23 = vadd.f32 %v413_v22, %v397_v19 }
 0x1d6   : > { %v420_v36 = vpop.permute.xlu2 %419 }
 0x1d7   : > { %v431_v63 = vmul.f32 %v430_v44, %v420_v36 }
 0x1df   : > { %v439_v39 = vpop.permute.xlu2 %438 }
 0x1e0   : > { %v450_v2 = vmul.f32 %v449_v45, %v439_v39 }
 0x1e7   : > { %v447_v46 = vpop.permute.xlu2 %446 }
 0x1e8   : > { %v452_v49 = vmul.f32 %v449_v45, %v447_v46 }
 0x1ef   : > { %v354_v9 = vpop.permute.xlu0 %353 }
 0x1f0   : > { %v356_v10 = vmul.f32 %v354_v9, %v1162_v11  ;;  %v1241_v56 = vpop.permute.xlu2 %465 }
 0x1f2   : > { %358 = vrot.lane.b32.xlu0 %v356_v10, %s1075_s17 }
 0x1fa   : > { %423 = vperm.xlu0 %966, %v376_v8  }
 0x202   : > { %970 = vset.pattern.permute.xlu0 %v1077_v14 }
 0x203   : > { %457 = vperm.xlu0 %970, %v375_v4  }
 0x20b   : > { %971 = vset.pattern.permute.xlu0 %v1072_v5 }
 0x20c   : > { %392 = vperm.xlu0 %971, %v377_v13  }
 0x264   : > { %v359_v24 = vpop.permute.xlu0 %358 }
 0x265   : > { %362 = vst.msk [vmem:[#allocation2] sm:$0xff] %vm361_vm9, %v359_v24  ;;  %v363_v25 = vmul.f32 %v359_v24, %v1177_v55 }
 0x267   : > { %365 = vrot.lane.b32.xlu1 %v363_v25, %s1078_s22 }
 0x26c   : > { %v481_v26 = vld [vmem:[#allocation2] sm:$0xff]  ;;  %v1228_v33 = vpop.permute.xlu0 %423 }
 0x26d   : > { %484 = vperm.xlu2 %975, %v481_v26   ;;  %v432_v25 = vmul.f32 %v430_v44, %v1228_v33 }
 0x26f   : > { %400 = vperm.xlu1 %963, %v375_v4  }
 0x275   : > { %503 = vperm.xlu2 %975, %v379_v29   ;;  %v458_v37 = vpop.permute.xlu0 %457 }
 0x277   : > { %408 = vperm.xlu1 %963, %v377_v13  }
 0x27d   : > { %977 = vset.pattern.permute.xlu2 %v1073_v6 }
 0x27e   : > { %523 = vperm.xlu2 %977, %v378_v30   ;;  %v393_v41 = vpop.permute.xlu0 %392 }
 0x27f   : > { %967 = vset.pattern.permute.xlu1 %v1073_v6  ;;  %v398_v43 = vmul.f32 %v1204_v18, %v393_v41 }
 0x286   : > { %980 = vset.pattern.permute.xlu2 %v1081_v32 }
 0x287   : > { %562 = vperm.xlu2 %980, %v378_v30  }
 0x28f   : > { %982 = vset.pattern.permute.xlu2 %v1082_v35 }
 0x290   : > { %588 = vperm.xlu2 %982, %v378_v30  }
 0x298   : > { %984 = vset.pattern.permute.xlu2 %v1073_v6 }
 0x299   : > { %527 = vperm.xlu2 %984, %v379_v29  }
 0x2a1   : > { %986 = vset.pattern.permute.xlu2 %v1081_v32 }
 0x2a2   : > { %566 = vperm.xlu2 %986, %v379_v29  }
 0x2c7   : > { %v485_v58 = vpop.permute.xlu2 %484 }
 0x2cf   : > { %v504_v62 = vpop.permute.xlu2 %503 }
 0x2d9   : > { %v366_v27 = vpop.permute.xlu1 %365 }
 0x2da   : > { %v368_v28 = vsub.f32 %v1162_v11, %v366_v27 }
 0x2dc   : > { %370 = vrot.lane.b32.xlu1 %v368_v28, %s1079_s28 }
 0x2e1   : > { %v401_v34 = vpop.permute.xlu1 %400 }
 0x2e2   : > { %v412_v61 = vmul.f32 %v1208_v20, %v401_v34 }
 0x2e4   : > { %427 = vperm.xlu1 %967, %v377_v13   ;;  %v415_v0 = vadd.f32 %v412_v61, %v396_v60  ;;  %v611_v60 = vstv %s1156_s27 }
 0x2e6   : > { %v434_v4 = vadd.f32 %v431_v63, %v415_v0 }
 0x2e8   : > { %v453_v6 = vadd.f32 %v450_v2, %v434_v4 }
 0x2e9   : > { %v409_v38 = vpop.permute.xlu1 %408 }
 0x2ea   : > { %v414_v42 = vmul.f32 %v1208_v20, %v409_v38 }
 0x2ec   : > { %969 = vset.pattern.permute.xlu1 %v1076_v12  ;;  %v417_v50 = vadd.f32 %v414_v42, %v398_v43 }
 0x2ed   : > { %442 = vperm.xlu1 %969, %v376_v8  }
 0x2f5   : > { %972 = vset.pattern.permute.xlu1 %v1077_v14 }
 0x2f6   : > { %461 = vperm.xlu1 %972, %v376_v8  }
 0x2fe   : > { %974 = vset.pattern.permute.xlu1 %v1072_v5  ;;  %v469_v5 = vmul.f32 %v1247_v3, %v458_v37 }
 0x2ff   : > { %477 = vperm.xlu1 %974, %v1162_v11  }
 0x300   : > { %v472_v8 = vadd.f32 %v469_v5, %v453_v6 }
 0x307   : > { %498 = vperm.xlu1 %974, %v378_v30  }
 0x30f   : > { %976 = vset.pattern.permute.xlu1 %v1074_v7 }
 0x310   : > { %510 = vperm.xlu1 %976, %v378_v30  }
 0x318   : > { %979 = vset.pattern.permute.xlu1 %v1077_v14 }
 0x319   : > { %549 = vperm.xlu1 %979, %v378_v30  }
 0x321   : > { %981 = vset.pattern.permute.xlu1 %v1080_v31 }
 0x322   : > { %575 = vperm.xlu1 %981, %v378_v30  }
 0x32a   : > { %983 = vset.pattern.permute.xlu1 %v1074_v7  ;;  %v524_v7 = vpop.permute.xlu2 %523 }
 0x32b   : > { %514 = vperm.xlu1 %983, %v379_v29  }
 0x332   : > { %v563_v13 = vpop.permute.xlu2 %562 }
 0x333   : > { %985 = vset.pattern.permute.xlu1 %v1077_v14 }
 0x334   : > { %553 = vperm.xlu1 %985, %v379_v29  }
 0x33a   : > { %v589_v27 = vpop.permute.xlu2 %588 }
 0x33c   : > { %988 = vset.pattern.permute.xlu1 %v1082_v35  ;;  %v435_v35 = vadd.f32 %v432_v25, %v1211_v23 }
 0x33d   : > { %592 = vperm.xlu1 %988, %v379_v29  }
 0x34e   : > { %v371_v40 = vpop.permute.xlu1 %370 }
 0x34f   : > { %373 = vst.msk [vmem:[#allocation3] sm:$0xff] %vm361_vm9, %v371_v40 }
 0x356   : > { %v428_v47 = vpop.permute.xlu1 %427  ;;  %v488_v48 = vld [vmem:[#allocation3] sm:$0xff] }
 0x357   : > { %v433_v51 = vmul.f32 %v430_v44, %v428_v47  ;;  %491 = vperm.xlu0 %971, %v488_v48   ;;  %v606_v47 = vlaneseq }
 0x359   : > { %v436_v52 = vadd.f32 %v433_v51, %v417_v50 }
 0x35b   : > { %v1236_v53 = vadd.f32 %v452_v49, %v436_v52 }
 0x35f   : > { %978 = vset.pattern.permute.xlu0 %v1076_v12  ;;  %v443_v54 = vpop.permute.xlu1 %442 }
 0x360   : > { %536 = vperm.xlu0 %978, %v378_v30   ;;  %v451_v36 = vmul.f32 %v449_v45, %v443_v54  ;;  %v528_v45 = vpop.permute.xlu2 %527  ;;  %v607_v54 = vand.u32 127, %v606_v47 }
 0x362   : > { %v454_v43 = vadd.f32 %v451_v36, %v435_v35  ;;  %vm612_vm10 = vcmp.lt.s32.totalorder %v607_v54, %v611_v60 }
 0x368   : > { %602 = vperm.xlu0 %978, %v1162_v11   ;;  %v462_v55 = vpop.permute.xlu1 %461 }
 0x369   : > { %v470_v44 = vmul.f32 %v1247_v3, %v462_v55 }
 0x370   : > { %540 = vperm.xlu0 %978, %v379_v29  }
 0x371   : > { %v478_v57 = vpop.permute.xlu1 %477 }
 0x372   : > { %v480_v10 = vadd.f32 %v478_v57, %v472_v8  ;;  %v473_v57 = vadd.f32 %v470_v44, %v454_v43  ;;  %v567_v8 = vpop.permute.xlu2 %566 }
 0x378   : > { %987 = vset.pattern.permute.xlu0 %v1080_v31 }
 0x379   : > { %579 = vperm.xlu0 %987, %v379_v29   ;;  %v499_v59 = vpop.permute.xlu1 %498 }
 0x381   : > { %989 = vset.pattern.permute.xlu0 %v1076_v12  ;;  %v487_v12 = vmul.f32 %v485_v58, %v480_v10 }
 0x382   : > { %v511_v1 = vpop.permute.xlu1 %510 }
 0x38b   : > { %v550_v9 = vpop.permute.xlu1 %549 }
 0x394   : > { %v576_v18 = vpop.permute.xlu1 %575 }
 0x39d   : > { %v515_v37 = vpop.permute.xlu1 %514 }
 0x3a6   : > { %v554_v61 = vpop.permute.xlu1 %553 }
 0x3c9   : > { %v492_v14 = vpop.permute.xlu0 %491 }
 0x3ca   : > { %v494_v15 = vadd.f32 %v492_v14, %v487_v12  ;;  %v593_v12 = vpop.permute.xlu1 %592  ;;  %v471_v14 = vmul.f32 %v1247_v3, %v1241_v56 }
 0x3cc   : > { %v1250_v16 = vmax.f32 %v494_v15, 0.0 }
 0x3ce   : > { %v506_v19 = vperm.slane %v1250_v16, 0  ;;  %v517_v17 = vperm.slane %v1250_v16, 1  ;;  %v530_v20 = vperm.slane %v1250_v16, 2  ;;  %v543_v24 = vperm.slane %v1250_v16, 3 }
 0x3cf   : > { %v556_v30 = vperm.slane %v1250_v16, 4  ;;  %v569_v32 = vperm.slane %v1250_v16, 5  ;;  %v582_v40 = vperm.slane %v1250_v16, 6  ;;  %v595_v33 = vperm.slane %v1250_v16, 7 }
 0x3d0   : > { %v507_v21 = vmul.f32 %v506_v19, %v499_v59  ;;  %v518_v22 = vmul.f32 %v517_v17, %v511_v1  ;;  %v531_v29 = vmul.f32 %v530_v20, %v524_v7  ;;  %v508_v50 = vmul.f32 %v506_v19, %v504_v62 }
 0x3d1   : > { %v557_v38 = vmul.f32 %v556_v30, %v550_v9  ;;  %v570_v41 = vmul.f32 %v569_v32, %v563_v13  ;;  %v583_v49 = vmul.f32 %v582_v40, %v576_v18  ;;  %v519_v23 = vmul.f32 %v517_v17, %v515_v37 }
 0x3d2   : > { %v537_v26 = vpop.permute.xlu0 %536  ;;  %v520_v28 = vadd.f32 %v518_v22, %v507_v21  ;;  %v596_v51 = vmul.f32 %v595_v33, %v589_v27  ;;  %v532_v0 = vmul.f32 %v530_v20, %v528_v45  ;;  %v558_v6 = vmul.f32 %v556_v30, %v554_v61 }
 0x3d3   : > { %v544_v31 = vmul.f32 %v543_v24, %v537_v26  ;;  %v521_v59 = vadd.f32 %v519_v23, %v508_v50  ;;  %v571_v10 = vmul.f32 %v569_v32, %v567_v8  ;;  %v597_v18 = vmul.f32 %v595_v33, %v593_v12  ;;  %v622_v26 = vld [vmem:[#allocation5] sm:$0xff] }
 0x3d4   : > { %v533_v34 = vadd.f32 %v531_v29, %v520_v28  ;;  %v474_v17 = vadd.f32 %v471_v14, %v1236_v53  ;;  %v1083_v22 = vmov 0.0  }
 0x3d5   : > { %v534_v2 = vadd.f32 %v532_v0, %v521_v59  ;;  %634 = vst [vmem:[#allocation10] sm:$0x1] %v1083_v22 }
 0x3d6   : > { %v546_v39 = vadd.f32 %v544_v31, %v533_v34 }
 0x3d8   : > { %v559_v42 = vadd.f32 %v557_v38, %v546_v39 }
 0x3da   : > { %v603_v46 = vpop.permute.xlu0 %602  ;;  %v572_v48 = vadd.f32 %v570_v41, %v559_v42 }
 0x3dc   : > { %v585_v52 = vadd.f32 %v583_v49, %v572_v48 }
 0x3de   : > { %v598_v58 = vadd.f32 %v596_v51, %v585_v52 }
 0x3e0   : > { %v600_v63 = vadd.f32 %v598_v58, %v473_v57 }
 0x3e2   : > { %v541_v1 = vpop.permute.xlu0 %540  ;;  %v605_v55 = vadd.f32 %v603_v46, %v600_v63 }
 0x3e3   : > { %v545_v4 = vmul.f32 %v543_v24, %v541_v1  ;;  %v616_v24 = vld [vmem:[#allocation4] sm:$0xff] }
 0x3e4   : > { %630 = vst [vmem:[#allocation6] sm:$0xff] %v605_v55  ;;  %v615_v62 = vsel %vm612_vm10, %v605_v55, 0.0 }
 0x3e5   : > { %v547_v5 = vadd.f32 %v545_v4, %v534_v2  ;;  %617 = vadd.xlane.f32.xlu2 %v615_v62  ;;  %v623_v7 = vmul.f32 %v615_v62, %v615_v62 }
 0x3e7   : > { %v560_v9 = vadd.f32 %v558_v6, %v547_v5  ;;  %624 = vadd.xlane.f32.xlu1 %v623_v7 }
 0x3e9   : > { %v573_v15 = vadd.f32 %v571_v10, %v560_v9 }
 0x3eb   : > { %v580_v13 = vpop.permute.xlu0 %579 }
 0x3ec   : > { %v584_v16 = vmul.f32 %v582_v40, %v580_v13 }
 0x3ee   : > { %v586_v19 = vadd.f32 %v584_v16, %v573_v15 }
 0x3f0   : > { %v599_v20 = vadd.f32 %v597_v18, %v586_v19 }
 0x3f2   : > { %v631_v21 = vadd.f32 %v599_v20, %v474_v17 }
 0x3f4   : > { %633 = vst [vmem:[#allocation7] sm:$0x1] %v631_v21 }
 0x458   : > { %v618_v25 = vpop.xlane.xlu2 %617 }
 0x459   : > { %v619_v27 = vadd.f32 %v618_v25, %v616_v24 }
 0x45a   : > { %v625_v28 = vpop.xlane.xlu1 %624 }
 0x45b   : > { %621 = vst.msk [vmem:[#allocation4] sm:$0xff] %vm361_vm9, %v619_v27  ;;  %v626_v29 = vadd.f32 %v625_v28, %v622_v26 }
 0x45d   : > { %627 = vst.msk [vmem:[#allocation5] sm:$0xff] %vm361_vm9, %v626_v29 }
 0x45e PF: > { %p883_p6 = scmp.ne.s32.totalorder %s1055_s23, 2 }
 0x45f   : > { %s1084_s23 = smov (!%p883_p6), 4   ;;  %s1085_s27 = smov (!%p883_p6), 124  }
 0x460   : > { %638 = sbr.rel (%p883_p6) target bundleno = 1778 (0x6f2), region = 60  ;;  %s1092_s12 = smov (!%p883_p6), 123  }
 0x465   : > { %v643_v53 = vld [vmem:[#allocation4] sm:$0xff]  ;;  %v644_v56 = vstv %s1164_s7  ;;  %v646_v3 = vld [vmem:[#allocation5] sm:$0xff]  ;;  %v1086_v46 = vmov 0   ;;  %vm671_vm14 = vcmask 7168   ;;  %s1087_s7 = smov 5   ;;  %v1088_v23 = vmov 1  }
 0x466   : > { %v645_v30 = vmul.f32 %v644_v56, %v643_v53  ;;  %v647_v31 = vmul.f32 %v646_v3, %v644_v56  ;;  %992 = vset.pattern.permute.xlu2 %v1086_v46  ;;  %994 = vset.pattern.permute.xlu1 %v1086_v46  ;;  %v704_v50 = vld [vmem:[%s1297_s4] sm:$0x1]  ;;  %v1089_v45 = vmov 5   ;;  %v1090_v51 = vmov 2  }
 0x467   : > { %993 = vset.pattern.permute.xlu0 %v1088_v23  ;;  %v1091_v52 = vmov 6   ;;  %v1093_v58 = vmov 3   ;;  %v1094_v61 = vmov 4   ;;  %v1095_v63 = vmov 7   ;;  %v686_v2 = vld [vmem:[#allocation6] sm:$0xff] }
 0x468   : > { %v648_v32 = vmul.f32 %v645_v30, %v645_v30 }
 0x46a   : > { %v649_v34 = vsub.f32 %v647_v31, %v648_v32 }
 0x46c   : > { %v650_v35 = vmax.f32 %v649_v34, 0.0 }
 0x46e   : > { %v651_v36 = vadd.f32 1e-05, %v650_v35 }
 0x470   : > { %1003 = vrsqrt.f32 %v651_v36  ;;  %vm658_vm11 = vweird.f32 %v651_v36 }
 0x476   : > { %v1004_v37 = vpop.eup %1003 }
 0x477   : > { %v653_v38 = vmul.f32 %v1004_v37, %v651_v36  ;;  %vm659_vm12 = vweird.f32 %v1004_v37 }
 0x478   : > { %vm660_vm13 = vmor %vm658_vm11, %vm659_vm12 }
 0x479   : > { %v654_v39 = vmul.f32 %v1004_v37, %v653_v38 }
 0x47b   : > { %v655_v40 = vmul.f32 0.5, %v654_v39 }
 0x47d   : > { %v656_v33 = vsub.f32 1.5, %v655_v40 }
 0x47f   : > { %v657_v41 = vmul.f32 %v1004_v37, %v656_v33  ;;  %v688_v33 = vld [vmem:[#allocation7] sm:$0x1] }
 0x481   : > { %v661_v42 = vsel %vm660_vm13, %v1004_v37, %v657_v41 }
 0x482   : > { %663 = vrot.lane.b32.xlu0 %v661_v42, %s1084_s23 }
 0x4f4   : > { %v664_v43 = vpop.permute.xlu0 %663 }
 0x4f5   : > { %v666_v44 = vmul.f32 %v664_v43, %v1162_v11 }
 0x4f7   : > { %668 = vrot.lane.b32.xlu0 %v666_v44, %s1085_s27 }
 0x4ff   : > { %713 = vperm.xlu0 %993, %v704_v50  }
 0x507   : > { %999 = vset.pattern.permute.xlu0 %v1089_v45 }
 0x508   : > { %753 = vperm.xlu0 %999, %v704_v50  }
 0x510   : > { %1002 = vset.pattern.permute.xlu0 %v1091_v52 }
 0x569   : > { %v669_v47 = vpop.permute.xlu0 %668 }
 0x56a   : > { %672 = vst.msk [vmem:[#allocation4] sm:$0xff] %vm671_vm14, %v669_v47  ;;  %v673_v48 = vmul.f32 %v669_v47, %v645_v30 }
 0x56c   : > { %675 = vrot.lane.b32.xlu1 %v673_v48, %s1087_s7 }
 0x571   : > { %v689_v49 = vld [vmem:[#allocation4] sm:$0xff]  ;;  %v714_v4 = vpop.permute.xlu0 %713 }
 0x572   : > { %692 = vperm.xlu2 %992, %v689_v49   ;;  %v716_v7 = vperm.slane %v714_v4, 0 }
 0x57a   : > { %995 = vset.pattern.permute.xlu2 %v1090_v51  ;;  %v754_v13 = vpop.permute.xlu0 %753 }
 0x57b   : > { %723 = vperm.xlu2 %995, %v704_v50   ;;  %v756_v17 = vperm.slane %v754_v13, 0 }
 0x583   : > { %997 = vset.pattern.permute.xlu2 %v1086_v46 }
 0x5cc   : > { %v693_v0 = vpop.permute.xlu2 %692 }
 0x5cd   : > { %v695_v5 = vmul.f32 %v693_v0, %v686_v2 }
 0x5d5   : > { %v724_v55 = vpop.permute.xlu2 %723 }
 0x5d6   : > { %v726_v9 = vperm.slane %v724_v55, 0 }
 0x5de   : > { %v676_v54 = vpop.permute.xlu1 %675 }
 0x5df   : > { %v678_v57 = vsub.f32 %v1162_v11, %v676_v54 }
 0x5e1   : > { %680 = vrot.lane.b32.xlu1 %v678_v57, %s1092_s12 }
 0x5e9   : > { %707 = vperm.xlu1 %994, %v704_v50  }
 0x5f1   : > { %996 = vset.pattern.permute.xlu1 %v1093_v58 }
 0x5f2   : > { %733 = vperm.xlu1 %996, %v704_v50  }
 0x5fa   : > { %1000 = vset.pattern.permute.xlu1 %v1091_v52 }
 0x5fb   : > { %763 = vperm.xlu1 %1000, %v704_v50  }
 0x603   : > { %785 = vperm.xlu1 %1000, %v1162_v11  }
 0x653   : > { %v681_v59 = vpop.permute.xlu1 %680 }
 0x654   : > { %683 = vst.msk [vmem:[#allocation5] sm:$0xff] %vm671_vm14, %v681_v59 }
 0x65b   : > { %v696_v60 = vld [vmem:[#allocation5] sm:$0xff]  ;;  %v708_v1 = vpop.permute.xlu1 %707 }
 0x65c   : > { %699 = vperm.xlu2 %997, %v696_v60   ;;  %v710_v12 = vperm.slane %v708_v1, 0 }
 0x664   : > { %998 = vset.pattern.permute.xlu2 %v1094_v61  ;;  %v734_v62 = vpop.permute.xlu1 %733 }
 0x665   : > { %743 = vperm.xlu2 %998, %v704_v50   ;;  %v736_v10 = vperm.slane %v734_v62, 0 }
 0x66d   : > { %1001 = vset.pattern.permute.xlu2 %v1095_v63  ;;  %v764_v21 = vpop.permute.xlu1 %763 }
 0x66e   : > { %773 = vperm.xlu2 %1001, %v704_v50   ;;  %v766_v29 = vperm.slane %v764_v21, 0 }
 0x675   : > { %v786_v43 = vpop.permute.xlu1 %785 }
 0x6b6   : > { %v700_v6 = vpop.permute.xlu2 %699 }
 0x6b7   : > { %v702_v11 = vadd.f32 %v700_v6, %v695_v5 }
 0x6b9   : > { %v703_v8 = vmax.f32 %v702_v11, 0.0 }
 0x6bb   : > { %v727_v14 = vmul.f32 %v726_v9, %v703_v8  ;;  %v717_v15 = vmul.f32 %v716_v7, %v703_v8  ;;  %v711_v16 = vmul.f32 %v710_v12, %v703_v8  ;;  %v737_v18 = vmul.f32 %v736_v10, %v703_v8 }
 0x6bc   : > { %v757_v53 = vmul.f32 %v756_v17, %v703_v8  ;;  %v767_v31 = vmul.f32 %v766_v29, %v703_v8 }
 0x6bd   : > { %v719_v19 = vrot.slane %v717_v15, 1  ;;  %v729_v22 = vrot.slane %v727_v14, 2  ;;  %v739_v26 = vrot.slane %v737_v18, 3 }
 0x6be   : > { %v759_v32 = vrot.slane %v757_v53, 5  ;;  %v769_v37 = vrot.slane %v767_v31, 6 }
 0x6bf   : > { %v744_v20 = vpop.permute.xlu2 %743  ;;  %v721_v24 = vadd.f32 %v719_v19, %v711_v16 }
 0x6c0   : > { %v746_v25 = vperm.slane %v744_v20, 0 }
 0x6c1   : > { %v731_v27 = vadd.f32 %v729_v22, %v721_v24 }
 0x6c2   : > { %v747_v28 = vmul.f32 %v746_v25, %v703_v8 }
 0x6c3   : > { %v741_v56 = vadd.f32 %v739_v26, %v731_v27 }
 0x6c4   : > { %v749_v3 = vrot.slane %v747_v28, 4 }
 0x6c6   : > { %v751_v30 = vadd.f32 %v749_v3, %v741_v56 }
 0x6c8   : > { %v774_v34 = vpop.permute.xlu2 %773  ;;  %v761_v35 = vadd.f32 %v759_v32, %v751_v30 }
 0x6c9   : > { %v776_v36 = vperm.slane %v774_v34, 0 }
 0x6ca   : > { %v771_v39 = vadd.f32 %v769_v37, %v761_v35 }
 0x6cb   : > { %v777_v38 = vmul.f32 %v776_v36, %v703_v8 }
 0x6cd   : > { %v779_v40 = vrot.slane %v777_v38, 7 }
 0x6cf   : > { %v781_v41 = vadd.f32 %v779_v40, %v771_v39 }
 0x6d1   : > { %v782_v42 = vadd.f32 %v781_v41, %v688_v33 }
 0x6d3   : > { %v788_v44 = vadd.f32 %v786_v43, %v782_v42 }
 0x6d5   : > { %v884_v46 = vmul.f32 -1.442695, %v788_v44 }
 0x6d7   : > { %1005 = vpow2.f32 %v884_v46 }
 0x6dd   : > { %v1006_v47 = vpop.eup %1005 }
 0x6de   : > { %v792_v48 = vadd.f32 1.0, %v1006_v47 }
 0x6e0   : > { %1007 = vrcp.f32 %v792_v48  ;;  %v804_v45 = vand.u32 2147483648, %v792_v48  ;;  %v802_v52 = vand.u32 2147483647, %v792_v48  ;;  %vm798_vm0 = vweird.f32 %v792_v48 }
 0x6e2   : > { %v805_v57 = vor.u32 1.1754944e-38, %v804_v45  ;;  %vm803_vm2 = vcmp.eq.f32.partialorder %v802_v52, 8.507059e+37 }
 0x6e6   : > { %v1008_v49 = vpop.eup %1007 }
 0x6e7   : > { %v794_v50 = vmul.f32 %v1008_v49, %v792_v48  ;;  %vm799_vm15 = vweird.f32 %v1008_v49 }
 0x6e8   : > { %vm800_vm1 = vmor %vm798_vm0, %vm799_vm15 }
 0x6e9   : > { %v795_v23 = vsub.f32 1.0, %v794_v50 }
 0x6eb   : > { %v796_v51 = vmul.f32 %v1008_v49, %v795_v23 }
 0x6ed   : > { %v797_v54 = vadd.f32 %v1008_v49, %v796_v51 }
 0x6ef   : > { %v801_v58 = vsel %vm800_vm1, %v1008_v49, %v797_v54 }
 0x6f0   : > { %v806_v59 = vsel %vm803_vm2, %v805_v57, %v801_v58 }
 0x6f1   : > { %808 = vst [vmem:[#allocation10] sm:$0x1] %v806_v59 }
 0x6f2 PF: > { %p895_p7 = scmp.eq.s32.totalorder %s877_s0, 2  ;;  %s818_s15 = sshll.u32 %s1299_s6, 4  ;;  %s819_s15 = int_to_ptr.hbm [resolvable:$true] %s818_s15 }
 0x6f3   : > { %s1096_s16 = smov [#allocation10]  }
 0x6f4   : > { %s816_s17 = sshll.u32 %s1096_s16, 4  ;;  %s817_s17 = int_to_ptr.vmem [resolvable:$true] %s816_s17 }
 0x6f5   : > { %892 = dma.vmem_to_hbm [thread:$0]  (%p895_p7), %s817_s17, 16, %s819_s15, [#allocation11]  }
 0x6f6   : > { %1050 = dma.done.wait (%p895_p7), [#allocation11], 16  }
 0x6f7   : > { %1052 = vsyncadd (%p895_p7), [#allocation11], 4294967280 }
 0x6f8 PF: > { %s18_s25 = sadd.s32 1, %s1063_s25   ;;  %s1300_s23 = smov %s1059_s24 }
 0x6f9   : > { %p15_p8 = scmp.ge.s32.totalorder %s18_s25, 5   ;;  %s1301_s24 = smov %s1303_s26 }
 0x6fb   :  { %17 = sbr.rel (!%p15_p8) target bundleno = 4 (0x4), region = 96 }
 0x700   :  { %832 = vsyncpa [#allocation11], 1 }
 0x701   :  { %834 = vsyncpa [#allocation11 + $0x1], 1 }

</bundles_post_ra>
